<compile_context>
chip_gen: v6e
topology: v6e:2x2x1
jax: 0.10.0
libtpu: 0.0.40
codegen_flags: <defaults>
</compile_context>

<pallas_src>
import functools

import jax
import jax.numpy as jnp
from jax.experimental import pallas as pl
from jax.experimental.pallas import tpu as pltpu

NF = 64            # nf in DMNet
TM_TARGET = 8192   # max patch columns (lanes) per grid step
SUB = 256          # in-kernel lane sub-tile (multiple of 128)


def _cdiv(a, b):
    return -(-a // b)


def _round_up(a, b):
    return _cdiv(a, b) * b


def _device_kind():
    try:
        return jax.devices()[0].device_kind.lower()
    except Exception:
        return ""


def _has_bf16_vpu():
    # v6e / v7x have a bf16 VALU; v5e (and older / unknown) do not -> keep f32.
    kind = _device_kind()
    return ("v6" in kind) or ("v7" in kind)


def _dual_tensorcore():
    # v7x has 2 TensorCores per chip; keep the parallel grid evenly splittable.
    return "v7" in _device_kind()


def _dmnet_mlp_kernel(x_ref, w1_ref, b1_ref, wmid_ref, bmid_ref, w6_ref,
                      b6_ref, o_ref, *, n_sub, bf16_elem):
    w1 = w1_ref[...]                        # (nf, 4)  f32
    b1 = b1_ref[...]                        # (nf, 1)  f32
    bmid = bmid_ref[...]                    # (nf, 4)  f32
    b6 = b6_ref[...]                        # (4, 1)   f32
    w6 = w6_ref[...]                        # (4, nf)  bf16
    # Hoist the middle-layer weight loads out of the chunk loop (held in vregs).
    wm = [wmid_ref[l] for l in range(4)]    # 4 x (nf, nf) bf16
    bmid_b = bmid.astype(jnp.bfloat16) if bf16_elem else bmid

    # Static lane sub-tiling: per-chunk activations (nf, SUB) stay small enough
    # for the vreg file; chunks are independent so VPU/EUP work of one chunk
    # overlaps the MXU passes of its neighbours.
    for c in range(n_sub):
        sl = slice(c * SUB, (c + 1) * SUB)
        x = x_ref[:, sl]                    # (4, SUB) f32

        # conv1: 2x2 patch -> nf.  K=4 would waste an MXU pass, so do it as
        # four broadcast FMAs on the VPU (different VLIW slot than the MXU).
        h = (w1[:, 0:1] * x[0:1, :] + w1[:, 1:2] * x[1:2, :]
             + w1[:, 2:3] * x[2:3, :] + w1[:, 3:4] * x[3:4, :] + b1)
        h = jnp.maximum(h, 0.0).astype(jnp.bfloat16)

        # conv2..conv5: 1x1 convs == (nf, nf) @ (nf, SUB) bf16 MXU matmuls,
        # f32 accumulation.  Bias+ReLU in bf16 only where the VALU supports it.
        for l in range(4):
            acc = jnp.dot(wm[l], h, preferred_element_type=jnp.float32)
            if bf16_elem:
                h = jnp.maximum(acc.astype(jnp.bfloat16) + bmid_b[:, l:l + 1],
                                0.0)
            else:
                h = jnp.maximum(acc + bmid[:, l:l + 1],
                                0.0).astype(jnp.bfloat16)

        # conv6: nf -> 4 (= upscale**2), f32 epilogue + tanh (EUP).
        o = jnp.dot(w6, h, preferred_element_type=jnp.float32) + b6
        o_ref[:, sl] = jnp.tanh(o)


def _pick_grid(m):
    """Lane tile / grid-step count.  tm is a multiple of SUB, capped at
    TM_TARGET; on 2-TC chips the step count is kept >= 2 and even."""
    tm = min(TM_TARGET, _round_up(m, SUB))
    steps = _cdiv(m, tm)
    if _dual_tensorcore():
        if steps == 1 and tm > SUB:
            tm = _round_up(tm // 2, SUB)
            steps = _cdiv(m, tm)
        if steps > 1 and steps % 2 == 1:
            steps += 1
    return tm, steps


def _run_mlp(patches_t, params):
    """patches_t: (4, M) f32 -> (4, M) f32 via the Pallas kernel."""
    w1, b1, wmid, bmid, w6, b6 = params
    nf = w1.shape[0]
    m = patches_t.shape[1]

    tm, steps = _pick_grid(m)
    mp = tm * steps
    if mp != m:
        patches_t = jnp.pad(patches_t, ((0, 0), (0, mp - m)))

    # Weights for the MXU layers go in as bf16 (f32 accumulation in-kernel).
    kparams = (w1, b1, wmid.astype(jnp.bfloat16), bmid,
               w6.astype(jnp.bfloat16), b6)

    def full(a):
        return pl.BlockSpec(a.shape, lambda i, nd=a.ndim: (0,) * nd)

    kernel = functools.partial(_dmnet_mlp_kernel,
                               n_sub=tm // SUB,
                               bf16_elem=_has_bf16_vpu())

    cost = pl.CostEstimate(
        flops=2 * mp * (4 * nf + 4 * nf * nf + nf * 4),
        transcendentals=mp * 4,
        bytes_accessed=2 * 4 * mp * 4
        + sum(int(p.size) * p.dtype.itemsize for p in kparams))

    out = pl.pallas_call(
        kernel,
        out_shape=jax.ShapeDtypeStruct((4, mp), jnp.float32),
        grid_spec=pltpu.PrefetchScalarGridSpec(
            num_scalar_prefetch=0,
            grid=(steps,),
            in_specs=[pl.BlockSpec((4, tm), lambda i: (0, i))]
                     + [full(p) for p in kparams],
            out_specs=pl.BlockSpec((4, tm), lambda i: (0, i)),
        ),
        compiler_params=pltpu.CompilerParams(
            dimension_semantics=("parallel",),
            vmem_limit_bytes=32 * 1024 * 1024),
        cost_estimate=cost,
    )(patches_t, *kparams)
    return out[:, :m]


def dmnet_forward(x, params):
    """x: (B, C, H, W) float32 (NCHW, H and W even). Returns (B, C, H, W)."""
    B, C, H, W = x.shape
    Hh, Wh = H // 2, W // 2
    # F.unfold(x, 2, stride=2): per-channel non-overlapping 2x2 patches,
    # inner-patch order row-major (dy, dx).  Laid out as (4, M) so the patch
    # axis M is the lane axis inside the kernel.
    patches_t = (x.reshape(B, C, Hh, 2, Wh, 2)
                  .transpose(3, 5, 0, 1, 2, 4)
                  .reshape(4, B * C * Hh * Wh)
                  .astype(jnp.float32))
    out = _run_mlp(patches_t, params)            # (4, M)
    # PixelShuffle(2) + permute + F.fold(stride=kernel=2) == inverse unfold.
    y = (out.reshape(2, 2, B, C, Hh, Wh)
            .transpose(2, 3, 4, 0, 5, 1)
            .reshape(B, C, H, W))
    return y


def init_dmnet_params(key, nf=NF):
    """Deterministic kaiming-normal weights, zero biases (matches __init__).

    Layout (all f32; conv2..conv6 weights are cast to bf16 at the kernel
    boundary):
      w1   (nf, 4)      conv1 weight, 2x2 kernel flattened row-major (out, in)
      b1   (nf, 1)
      wmid (4, nf, nf)  conv2..conv5 1x1 weights, stacked, (out, in)
      bmid (nf, 4)      conv2..conv5 biases, column l = layer l
      w6   (4, nf)      conv6 1x1 weight (out = upscale**2, in = nf)
      b6   (4, 1)
    """
    ks = jax.random.split(key, 6)

    def kaiming(k, out_c, fan_in):
        std = (2.0 / fan_in) ** 0.5
        return jax.random.normal(k, (out_c, fan_in), jnp.float32) * std

    w1 = kaiming(ks[0], nf, 4)
    b1 = jnp.zeros((nf, 1), jnp.float32)
    wmid = jnp.stack([kaiming(ks[i], nf, nf) for i in range(1, 5)])
    bmid = jnp.zeros((nf, 4), jnp.float32)
    w6 = kaiming(ks[5], 4, nf)
    b6 = jnp.zeros((4, 1), jnp.float32)
    return (w1, b1, wmid, bmid, w6, b6)


def _reference_forward(x, params, use_bf16=True):
    """Pure-JAX reference of the same math.

    use_bf16=True mirrors the kernel's bf16-matmul / f32-accumulate pattern;
    use_bf16=False is the original full-f32 module semantics."""
    B, C, H, W = x.shape
    Hh, Wh = H // 2, W // 2
    p = (x.reshape(B, C, Hh, 2, Wh, 2).transpose(0, 1, 2, 4, 3, 5)
          .reshape(-1, 4).astype(jnp.float32))          # (M, 4)
    w1, b1, wmid, bmid, w6, b6 = params

    def mm(a, w):                                       # a: (M, in), w: (out, in)
        if use_bf16:
            return jnp.dot(a.astype(jnp.bfloat16), w.astype(jnp.bfloat16).T,
                           preferred_element_type=jnp.float32)
        return a @ w.T

    h = jnp.maximum(p @ w1.T + b1[:, 0][None, :], 0.0)  # conv1 stays f32
    for l in range(4):
        h = jnp.maximum(mm(h, wmid[l]) + bmid[:, l][None, :], 0.0)
    o = jnp.tanh(mm(h, w6) + b6[:, 0][None, :])
    return (o.reshape(B, C, Hh, Wh, 2, 2).transpose(0, 1, 2, 4, 3, 5)
             .reshape(B, C, H, W))


if __name__ == "__main__":
    key = jax.random.PRNGKey(0)
    k_x, k_p = jax.random.split(key)

    # RGGB bayer-style input: B=2, C=4 planes, 16x16 spatial.
    x = jax.random.uniform(k_x, (2, 4, 16, 16), jnp.float32)
    params = init_dmnet_params(k_p)

    y = jax.block_until_ready(jax.jit(dmnet_forward)(x, params))
    assert y.shape == x.shape, y.shape

    # Tight check vs. a bf16-mirrored reference (same quantization pattern),
    # looser sanity check vs. the original full-f32 math.
    y_bf16 = _reference_forward(x, params, use_bf16=True)
    y_f32 = _reference_forward(x, params, use_bf16=False)
    assert jnp.allclose(y, y_bf16, atol=1e-2, rtol=1e-2), \
        float(jnp.max(jnp.abs(y - y_bf16)))
    assert jnp.allclose(y, y_f32, atol=1e-1, rtol=1e-1), \
        float(jnp.max(jnp.abs(y - y_f32)))

    print("KERNEL_OK")
</pallas_src>

<mosaic_0001>
module attributes {stable_mosaic.version = 11 : i64} {
  func.func @_dmnet_mlp_kernel(%arg0: i32, %arg1: memref<4x512xf32, #tpu.memory_space<vmem>>, %arg2: memref<64x4xf32, #tpu.memory_space<vmem>>, %arg3: memref<64x1xf32, #tpu.memory_space<vmem>>, %arg4: memref<4x64x64xbf16, #tpu.memory_space<vmem>>, %arg5: memref<64x4xf32, #tpu.memory_space<vmem>>, %arg6: memref<4x64xbf16, #tpu.memory_space<vmem>>, %arg7: memref<4x1xf32, #tpu.memory_space<vmem>>, %arg8: memref<4x512xf32, #tpu.memory_space<vmem>>) attributes {dimension_semantics = [#tpu.dimension_semantics<parallel>], iteration_bounds = array<i64: 1>, scalar_prefetch = 0 : i64, scratch_operands = 0 : i64, tpu.core_type = #tpu.core_type<tc>, window_params = [{transform_indices = @transform_0, window_bounds = array<i64: 4, 512>}, {pipeline_mode = #tpu.pipeline_mode<synchronous>, transform_indices = @transform_1, window_bounds = array<i64: 64, 4>}, {pipeline_mode = #tpu.pipeline_mode<synchronous>, transform_indices = @transform_2, window_bounds = array<i64: 64, 1>}, {pipeline_mode = #tpu.pipeline_mode<synchronous>, transform_indices = @transform_3, window_bounds = array<i64: 4, 64, 64>}, {pipeline_mode = #tpu.pipeline_mode<synchronous>, transform_indices = @transform_4, window_bounds = array<i64: 64, 4>}, {pipeline_mode = #tpu.pipeline_mode<synchronous>, transform_indices = @transform_5, window_bounds = array<i64: 4, 64>}, {pipeline_mode = #tpu.pipeline_mode<synchronous>, transform_indices = @transform_6, window_bounds = array<i64: 4, 1>}, {transform_indices = @transform_7, window_bounds = array<i64: 4, 512>}]} {
    %c0 = arith.constant 0 : index
    %c0_0 = arith.constant 0 : index
    %0 = vector.load %arg2[%c0, %c0_0] : memref<64x4xf32, #tpu.memory_space<vmem>>, vector<64x4xf32>
    %c0_1 = arith.constant 0 : index
    %c0_2 = arith.constant 0 : index
    %1 = vector.load %arg3[%c0_1, %c0_2] : memref<64x1xf32, #tpu.memory_space<vmem>>, vector<64x1xf32>
    %c0_3 = arith.constant 0 : index
    %c0_4 = arith.constant 0 : index
    %2 = vector.load %arg5[%c0_3, %c0_4] : memref<64x4xf32, #tpu.memory_space<vmem>>, vector<64x4xf32>
    %c0_5 = arith.constant 0 : index
    %c0_6 = arith.constant 0 : index
    %3 = vector.load %arg7[%c0_5, %c0_6] : memref<4x1xf32, #tpu.memory_space<vmem>>, vector<4x1xf32>
    %c0_7 = arith.constant 0 : index
    %c0_8 = arith.constant 0 : index
    %4 = vector.load %arg6[%c0_7, %c0_8] : memref<4x64xbf16, #tpu.memory_space<vmem>>, vector<4x64xbf16>
    %c0_9 = arith.constant 0 : index
    %c0_10 = arith.constant 0 : index
    %c0_11 = arith.constant 0 : index
    %5 = vector.load %arg4[%c0_9, %c0_10, %c0_11] : memref<4x64x64xbf16, #tpu.memory_space<vmem>>, vector<1x64x64xbf16>
    %6 = vector.shape_cast %5 : vector<1x64x64xbf16> to vector<64x64xbf16>
    %c1 = arith.constant 1 : index
    %c0_12 = arith.constant 0 : index
    %c0_13 = arith.constant 0 : index
    %7 = vector.load %arg4[%c1, %c0_12, %c0_13] : memref<4x64x64xbf16, #tpu.memory_space<vmem>>, vector<1x64x64xbf16>
    %8 = vector.shape_cast %7 : vector<1x64x64xbf16> to vector<64x64xbf16>
    %c2 = arith.constant 2 : index
    %c0_14 = arith.constant 0 : index
    %c0_15 = arith.constant 0 : index
    %9 = vector.load %arg4[%c2, %c0_14, %c0_15] : memref<4x64x64xbf16, #tpu.memory_space<vmem>>, vector<1x64x64xbf16>
    %10 = vector.shape_cast %9 : vector<1x64x64xbf16> to vector<64x64xbf16>
    %c3 = arith.constant 3 : index
    %c0_16 = arith.constant 0 : index
    %c0_17 = arith.constant 0 : index
    %11 = vector.load %arg4[%c3, %c0_16, %c0_17] : memref<4x64x64xbf16, #tpu.memory_space<vmem>>, vector<1x64x64xbf16>
    %12 = vector.shape_cast %11 : vector<1x64x64xbf16> to vector<64x64xbf16>
    %c0_18 = arith.constant 0 : index
    %c0_19 = arith.constant 0 : index
    %13 = vector.load %arg1[%c0_18, %c0_19] : memref<4x512xf32, #tpu.memory_space<vmem>>, vector<4x256xf32>
    %14 = vector.extract_strided_slice %0 {offsets = [0, 0], sizes = [64, 1], strides = [1, 1]} : vector<64x4xf32> to vector<64x1xf32>
    %15 = vector.extract_strided_slice %13 {offsets = [0, 0], sizes = [1, 256], strides = [1, 1]} : vector<4x256xf32> to vector<1x256xf32>
    %16 = vector.broadcast %14 : vector<64x1xf32> to vector<64x256xf32>
    %17 = vector.broadcast %15 : vector<1x256xf32> to vector<64x256xf32>
    %18 = arith.mulf %16, %17 : vector<64x256xf32>
    %19 = vector.extract_strided_slice %0 {offsets = [0, 1], sizes = [64, 1], strides = [1, 1]} : vector<64x4xf32> to vector<64x1xf32>
    %20 = vector.extract_strided_slice %13 {offsets = [1, 0], sizes = [1, 256], strides = [1, 1]} : vector<4x256xf32> to vector<1x256xf32>
    %21 = vector.broadcast %19 : vector<64x1xf32> to vector<64x256xf32>
    %22 = vector.broadcast %20 : vector<1x256xf32> to vector<64x256xf32>
    %23 = arith.mulf %21, %22 : vector<64x256xf32>
    %24 = arith.addf %18, %23 : vector<64x256xf32>
    %25 = vector.extract_strided_slice %0 {offsets = [0, 2], sizes = [64, 1], strides = [1, 1]} : vector<64x4xf32> to vector<64x1xf32>
    %26 = vector.extract_strided_slice %13 {offsets = [2, 0], sizes = [1, 256], strides = [1, 1]} : vector<4x256xf32> to vector<1x256xf32>
    %27 = vector.broadcast %25 : vector<64x1xf32> to vector<64x256xf32>
    %28 = vector.broadcast %26 : vector<1x256xf32> to vector<64x256xf32>
    %29 = arith.mulf %27, %28 : vector<64x256xf32>
    %30 = arith.addf %24, %29 : vector<64x256xf32>
    %31 = vector.extract_strided_slice %0 {offsets = [0, 3], sizes = [64, 1], strides = [1, 1]} : vector<64x4xf32> to vector<64x1xf32>
    %32 = vector.extract_strided_slice %13 {offsets = [3, 0], sizes = [1, 256], strides = [1, 1]} : vector<4x256xf32> to vector<1x256xf32>
    %33 = vector.broadcast %31 : vector<64x1xf32> to vector<64x256xf32>
    %34 = vector.broadcast %32 : vector<1x256xf32> to vector<64x256xf32>
    %35 = arith.mulf %33, %34 : vector<64x256xf32>
    %36 = arith.addf %30, %35 : vector<64x256xf32>
    %37 = vector.broadcast %1 : vector<64x1xf32> to vector<64x256xf32>
    %38 = arith.addf %36, %37 : vector<64x256xf32>
    %cst = arith.constant 0.000000e+00 : f32
    %39 = vector.broadcast %cst : f32 to vector<64x256xf32>
    %40 = arith.maximumf %38, %39 : vector<64x256xf32>
    %41 = arith.truncf %40 : vector<64x256xf32> to vector<64x256xbf16>
    %cst_20 = arith.constant dense<0.000000e+00> : vector<64x256xf32>
    %42 = tpu.matmul %6, %41, %cst_20 {dimension_numbers = #tpu.dot_dimension_numbers<[1], [0], [0], [1], [0, 0, 1, 1], [], []>} : vector<64x64xbf16>, vector<64x256xbf16>, vector<64x256xf32> -> vector<64x256xf32>
    %43 = vector.extract_strided_slice %2 {offsets = [0, 0], sizes = [64, 1], strides = [1, 1]} : vector<64x4xf32> to vector<64x1xf32>
    %44 = vector.broadcast %43 : vector<64x1xf32> to vector<64x256xf32>
    %45 = arith.addf %42, %44 : vector<64x256xf32>
    %cst_21 = arith.constant 0.000000e+00 : f32
    %46 = vector.broadcast %cst_21 : f32 to vector<64x256xf32>
    %47 = arith.maximumf %45, %46 : vector<64x256xf32>
    %48 = arith.truncf %47 : vector<64x256xf32> to vector<64x256xbf16>
    %cst_22 = arith.constant dense<0.000000e+00> : vector<64x256xf32>
    %49 = tpu.matmul %8, %48, %cst_22 {dimension_numbers = #tpu.dot_dimension_numbers<[1], [0], [0], [1], [0, 0, 1, 1], [], []>} : vector<64x64xbf16>, vector<64x256xbf16>, vector<64x256xf32> -> vector<64x256xf32>
    %50 = vector.extract_strided_slice %2 {offsets = [0, 1], sizes = [64, 1], strides = [1, 1]} : vector<64x4xf32> to vector<64x1xf32>
    %51 = vector.broadcast %50 : vector<64x1xf32> to vector<64x256xf32>
    %52 = arith.addf %49, %51 : vector<64x256xf32>
    %cst_23 = arith.constant 0.000000e+00 : f32
    %53 = vector.broadcast %cst_23 : f32 to vector<64x256xf32>
    %54 = arith.maximumf %52, %53 : vector<64x256xf32>
    %55 = arith.truncf %54 : vector<64x256xf32> to vector<64x256xbf16>
    %cst_24 = arith.constant dense<0.000000e+00> : vector<64x256xf32>
    %56 = tpu.matmul %10, %55, %cst_24 {dimension_numbers = #tpu.dot_dimension_numbers<[1], [0], [0], [1], [0, 0, 1, 1], [], []>} : vector<64x64xbf16>, vector<64x256xbf16>, vector<64x256xf32> -> vector<64x256xf32>
    %57 = vector.extract_strided_slice %2 {offsets = [0, 2], sizes = [64, 1], strides = [1, 1]} : vector<64x4xf32> to vector<64x1xf32>
    %58 = vector.broadcast %57 : vector<64x1xf32> to vector<64x256xf32>
    %59 = arith.addf %56, %58 : vector<64x256xf32>
    %cst_25 = arith.constant 0.000000e+00 : f32
    %60 = vector.broadcast %cst_25 : f32 to vector<64x256xf32>
    %61 = arith.maximumf %59, %60 : vector<64x256xf32>
    %62 = arith.truncf %61 : vector<64x256xf32> to vector<64x256xbf16>
    %cst_26 = arith.constant dense<0.000000e+00> : vector<64x256xf32>
    %63 = tpu.matmul %12, %62, %cst_26 {dimension_numbers = #tpu.dot_dimension_numbers<[1], [0], [0], [1], [0, 0, 1, 1], [], []>} : vector<64x64xbf16>, vector<64x256xbf16>, vector<64x256xf32> -> vector<64x256xf32>
    %64 = vector.extract_strided_slice %2 {offsets = [0, 3], sizes = [64, 1], strides = [1, 1]} : vector<64x4xf32> to vector<64x1xf32>
    %65 = vector.broadcast %64 : vector<64x1xf32> to vector<64x256xf32>
    %66 = arith.addf %63, %65 : vector<64x256xf32>
    %cst_27 = arith.constant 0.000000e+00 : f32
    %67 = vector.broadcast %cst_27 : f32 to vector<64x256xf32>
    %68 = arith.maximumf %66, %67 : vector<64x256xf32>
    %69 = arith.truncf %68 : vector<64x256xf32> to vector<64x256xbf16>
    %cst_28 = arith.constant dense<0.000000e+00> : vector<4x256xf32>
    %70 = tpu.matmul %4, %69, %cst_28 {dimension_numbers = #tpu.dot_dimension_numbers<[1], [0], [0], [1], [0, 0, 1, 1], [], []>} : vector<4x64xbf16>, vector<64x256xbf16>, vector<4x256xf32> -> vector<4x256xf32>
    %71 = vector.broadcast %3 : vector<4x1xf32> to vector<4x256xf32>
    %72 = arith.addf %70, %71 : vector<4x256xf32>
    %73 = math.tanh %72 : vector<4x256xf32>
    %c0_29 = arith.constant 0 : index
    %c0_30 = arith.constant 0 : index
    %74 = vector.load %arg8[%c0_29, %c0_30] : memref<4x512xf32, #tpu.memory_space<vmem>>, vector<4x256xf32>
    tpu.vector_store %arg8[%c0_29, %c0_30], %73 {strides = array<i32>} : memref<4x512xf32, #tpu.memory_space<vmem>>, vector<4x256xf32>,
    %c0_31 = arith.constant 0 : index
    %c256 = arith.constant 256 : index
    %75 = vector.load %arg1[%c0_31, %c256] : memref<4x512xf32, #tpu.memory_space<vmem>>, vector<4x256xf32>
    %76 = vector.extract_strided_slice %0 {offsets = [0, 0], sizes = [64, 1], strides = [1, 1]} : vector<64x4xf32> to vector<64x1xf32>
    %77 = vector.extract_strided_slice %75 {offsets = [0, 0], sizes = [1, 256], strides = [1, 1]} : vector<4x256xf32> to vector<1x256xf32>
    %78 = vector.broadcast %76 : vector<64x1xf32> to vector<64x256xf32>
    %79 = vector.broadcast %77 : vector<1x256xf32> to vector<64x256xf32>
    %80 = arith.mulf %78, %79 : vector<64x256xf32>
    %81 = vector.extract_strided_slice %0 {offsets = [0, 1], sizes = [64, 1], strides = [1, 1]} : vector<64x4xf32> to vector<64x1xf32>
    %82 = vector.extract_strided_slice %75 {offsets = [1, 0], sizes = [1, 256], strides = [1, 1]} : vector<4x256xf32> to vector<1x256xf32>
    %83 = vector.broadcast %81 : vector<64x1xf32> to vector<64x256xf32>
    %84 = vector.broadcast %82 : vector<1x256xf32> to vector<64x256xf32>
    %85 = arith.mulf %83, %84 : vector<64x256xf32>
    %86 = arith.addf %80, %85 : vector<64x256xf32>
    %87 = vector.extract_strided_slice %0 {offsets = [0, 2], sizes = [64, 1], strides = [1, 1]} : vector<64x4xf32> to vector<64x1xf32>
    %88 = vector.extract_strided_slice %75 {offsets = [2, 0], sizes = [1, 256], strides = [1, 1]} : vector<4x256xf32> to vector<1x256xf32>
    %89 = vector.broadcast %87 : vector<64x1xf32> to vector<64x256xf32>
    %90 = vector.broadcast %88 : vector<1x256xf32> to vector<64x256xf32>
    %91 = arith.mulf %89, %90 : vector<64x256xf32>
    %92 = arith.addf %86, %91 : vector<64x256xf32>
    %93 = vector.extract_strided_slice %0 {offsets = [0, 3], sizes = [64, 1], strides = [1, 1]} : vector<64x4xf32> to vector<64x1xf32>
    %94 = vector.extract_strided_slice %75 {offsets = [3, 0], sizes = [1, 256], strides = [1, 1]} : vector<4x256xf32> to vector<1x256xf32>
    %95 = vector.broadcast %93 : vector<64x1xf32> to vector<64x256xf32>
    %96 = vector.broadcast %94 : vector<1x256xf32> to vector<64x256xf32>
    %97 = arith.mulf %95, %96 : vector<64x256xf32>
    %98 = arith.addf %92, %97 : vector<64x256xf32>
    %99 = vector.broadcast %1 : vector<64x1xf32> to vector<64x256xf32>
    %100 = arith.addf %98, %99 : vector<64x256xf32>
    %cst_32 = arith.constant 0.000000e+00 : f32
    %101 = vector.broadcast %cst_32 : f32 to vector<64x256xf32>
    %102 = arith.maximumf %100, %101 : vector<64x256xf32>
    %103 = arith.truncf %102 : vector<64x256xf32> to vector<64x256xbf16>
    %cst_33 = arith.constant dense<0.000000e+00> : vector<64x256xf32>
    %104 = tpu.matmul %6, %103, %cst_33 {dimension_numbers = #tpu.dot_dimension_numbers<[1], [0], [0], [1], [0, 0, 1, 1], [], []>} : vector<64x64xbf16>, vector<64x256xbf16>, vector<64x256xf32> -> vector<64x256xf32>
    %105 = vector.extract_strided_slice %2 {offsets = [0, 0], sizes = [64, 1], strides = [1, 1]} : vector<64x4xf32> to vector<64x1xf32>
    %106 = vector.broadcast %105 : vector<64x1xf32> to vector<64x256xf32>
    %107 = arith.addf %104, %106 : vector<64x256xf32>
    %cst_34 = arith.constant 0.000000e+00 : f32
    %108 = vector.broadcast %cst_34 : f32 to vector<64x256xf32>
    %109 = arith.maximumf %107, %108 : vector<64x256xf32>
    %110 = arith.truncf %109 : vector<64x256xf32> to vector<64x256xbf16>
    %cst_35 = arith.constant dense<0.000000e+00> : vector<64x256xf32>
    %111 = tpu.matmul %8, %110, %cst_35 {dimension_numbers = #tpu.dot_dimension_numbers<[1], [0], [0], [1], [0, 0, 1, 1], [], []>} : vector<64x64xbf16>, vector<64x256xbf16>, vector<64x256xf32> -> vector<64x256xf32>
    %112 = vector.extract_strided_slice %2 {offsets = [0, 1], sizes = [64, 1], strides = [1, 1]} : vector<64x4xf32> to vector<64x1xf32>
    %113 = vector.broadcast %112 : vector<64x1xf32> to vector<64x256xf32>
    %114 = arith.addf %111, %113 : vector<64x256xf32>
    %cst_36 = arith.constant 0.000000e+00 : f32
    %115 = vector.broadcast %cst_36 : f32 to vector<64x256xf32>
    %116 = arith.maximumf %114, %115 : vector<64x256xf32>
    %117 = arith.truncf %116 : vector<64x256xf32> to vector<64x256xbf16>
    %cst_37 = arith.constant dense<0.000000e+00> : vector<64x256xf32>
    %118 = tpu.matmul %10, %117, %cst_37 {dimension_numbers = #tpu.dot_dimension_numbers<[1], [0], [0], [1], [0, 0, 1, 1], [], []>} : vector<64x64xbf16>, vector<64x256xbf16>, vector<64x256xf32> -> vector<64x256xf32>
    %119 = vector.extract_strided_slice %2 {offsets = [0, 2], sizes = [64, 1], strides = [1, 1]} : vector<64x4xf32> to vector<64x1xf32>
    %120 = vector.broadcast %119 : vector<64x1xf32> to vector<64x256xf32>
    %121 = arith.addf %118, %120 : vector<64x256xf32>
    %cst_38 = arith.constant 0.000000e+00 : f32
    %122 = vector.broadcast %cst_38 : f32 to vector<64x256xf32>
    %123 = arith.maximumf %121, %122 : vector<64x256xf32>
    %124 = arith.truncf %123 : vector<64x256xf32> to vector<64x256xbf16>
    %cst_39 = arith.constant dense<0.000000e+00> : vector<64x256xf32>
    %125 = tpu.matmul %12, %124, %cst_39 {dimension_numbers = #tpu.dot_dimension_numbers<[1], [0], [0], [1], [0, 0, 1, 1], [], []>} : vector<64x64xbf16>, vector<64x256xbf16>, vector<64x256xf32> -> vector<64x256xf32>
    %126 = vector.extract_strided_slice %2 {offsets = [0, 3], sizes = [64, 1], strides = [1, 1]} : vector<64x4xf32> to vector<64x1xf32>
    %127 = vector.broadcast %126 : vector<64x1xf32> to vector<64x256xf32>
    %128 = arith.addf %125, %127 : vector<64x256xf32>
    %cst_40 = arith.constant 0.000000e+00 : f32
    %129 = vector.broadcast %cst_40 : f32 to vector<64x256xf32>
    %130 = arith.maximumf %128, %129 : vector<64x256xf32>
    %131 = arith.truncf %130 : vector<64x256xf32> to vector<64x256xbf16>
    %cst_41 = arith.constant dense<0.000000e+00> : vector<4x256xf32>
    %132 = tpu.matmul %4, %131, %cst_41 {dimension_numbers = #tpu.dot_dimension_numbers<[1], [0], [0], [1], [0, 0, 1, 1], [], []>} : vector<4x64xbf16>, vector<64x256xbf16>, vector<4x256xf32> -> vector<4x256xf32>
    %133 = vector.broadcast %3 : vector<4x1xf32> to vector<4x256xf32>
    %134 = arith.addf %132, %133 : vector<4x256xf32>
    %135 = math.tanh %134 : vector<4x256xf32>
    %c0_42 = arith.constant 0 : index
    %c256_43 = arith.constant 256 : index
    %136 = vector.load %arg8[%c0_42, %c256_43] : memref<4x512xf32, #tpu.memory_space<vmem>>, vector<4x256xf32>
    tpu.vector_store %arg8[%c0_42, %c256_43], %135 {strides = array<i32>} : memref<4x512xf32, #tpu.memory_space<vmem>>, vector<4x256xf32>,
    return
  }
  func.func @transform_0(%arg0: i32) -> (i32, i32) {
    %c0_i32 = arith.constant 0 : i32
    %c0_i32_0 = arith.constant 0 : i32
    return %c0_i32, %arg0 : i32, i32
  }
  func.func @transform_1(%arg0: i32) -> (i32, i32) {
    %c0_i32 = arith.constant 0 : i32
    %c0_i32_0 = arith.constant 0 : i32
    %c0_i32_1 = arith.constant 0 : i32
    return %c0_i32, %c0_i32_0 : i32, i32
  }
  func.func @transform_2(%arg0: i32) -> (i32, i32) {
    %c0_i32 = arith.constant 0 : i32
    %c0_i32_0 = arith.constant 0 : i32
    %c0_i32_1 = arith.constant 0 : i32
    return %c0_i32, %c0_i32_0 : i32, i32
  }
  func.func @transform_3(%arg0: i32) -> (i32, i32, i32) {
    %c0_i32 = arith.constant 0 : i32
    %c0_i32_0 = arith.constant 0 : i32
    %c0_i32_1 = arith.constant 0 : i32
    %c0_i32_2 = arith.constant 0 : i32
    return %c0_i32, %c0_i32_0, %c0_i32_1 : i32, i32, i32
  }
  func.func @transform_4(%arg0: i32) -> (i32, i32) {
    %c0_i32 = arith.constant 0 : i32
    %c0_i32_0 = arith.constant 0 : i32
    %c0_i32_1 = arith.constant 0 : i32
    return %c0_i32, %c0_i32_0 : i32, i32
  }
  func.func @transform_5(%arg0: i32) -> (i32, i32) {
    %c0_i32 = arith.constant 0 : i32
    %c0_i32_0 = arith.constant 0 : i32
    %c0_i32_1 = arith.constant 0 : i32
    return %c0_i32, %c0_i32_0 : i32, i32
  }
  func.func @transform_6(%arg0: i32) -> (i32, i32) {
    %c0_i32 = arith.constant 0 : i32
    %c0_i32_0 = arith.constant 0 : i32
    %c0_i32_1 = arith.constant 0 : i32
    return %c0_i32, %c0_i32_0 : i32, i32
  }
  func.func @transform_7(%arg0: i32) -> (i32, i32) {
    %c0_i32 = arith.constant 0 : i32
    %c0_i32_0 = arith.constant 0 : i32
    return %c0_i32, %arg0 : i32, i32
  }
}

</mosaic_0001>

<bundles_post_ra>
// kernel: dmnet_forward.1
= control target key start
LH: loop header
LB: loop body
LE: loop exit
PB: predicated region body
PF: predicated region fallthrough
CT: control target
= control target key end

     0   :  { %v1997_v0 = vmov 1   ;;  %v130_v3 = vlaneseq  ;;  %v3174_v6 = vmov 0   ;;  %v3181_v9 = vmov 2   ;;  %s3166_s1 = inlined_call_operand.vmem [shape: f32[64,4], index: 1, kind: input, shape index: {}]   ;;  %s3167_s0 = inlined_call_operand.vmem [shape: f32[4,512], index: 0, kind: input, shape index: {}]   ;;  %s3168_s2 = inlined_call_operand.vmem [shape: f32[64,1], index: 2, kind: input, shape index: {}]   ;;  %s3169_s4 = inlined_call_operand.vmem [shape: f32[64,4], index: 4, kind: input, shape index: {}]   ;;  %s3170_s3 = inlined_call_operand.vmem [shape: bf16[4,64,64], index: 3, kind: input, shape index: {}]   ;;  %s3171_s6 = inlined_call_operand.vmem [shape: f32[4,1], index: 6, kind: input, shape index: {}]   ;;  %s3172_s5 = inlined_call_operand.vmem [shape: bf16[4,64], index: 5, kind: input, shape index: {}]   ;;  %s3173_s7 = inlined_call_operand.vmem [shape: f32[4,512], index: 7, kind: output, shape index: {}]  }
   0x1   :  { %1950 = vset.pattern.permute.xlu0 %v1997_v0  ;;  %1943 = vset.pattern.permute.xlu1 %v1997_v0  ;;  %v33_v1 = vld [vmem:[%s3166_s1 + $0x30] sm:$0xff]  ;;  %v34_v4 = vld [vmem:[%s3166_s1 + $0x38] sm:$0xff]  ;;  %v32_v12 = vld [vmem:[%s3166_s1 + $0x28] sm:$0xff]  ;;  %v3176_v29 = vmov 3   ;;  %vm550_vm0 = vcmask 523264  }
   0x2   :  { %v2049_v2 = vld [vmem:[%s3166_s1 + $0x10] sm:$0xff]  ;;  %189 = vperm.xlu1 %1943, %v33_v1   ;;  %v2055_v5 = vshrl.u32 %v130_v3, 7  ;;  %595 = vmatprep.mubr.bf16.mxu0 %v3174_v6  ;;  %v1199_v13 = vld [vmem:[%s3167_s0 + $0x8] sm:$0xff]  ;;  %v31_v23 = vld [vmem:[%s3166_s1 + $0x20] sm:$0xff] }
   0x3   :  { %173 = vperm.xlu0 %1950, %v2049_v2   ;;  %756 = vmatprep.mubr.bf16.mxu1 %v3174_v6  ;;  %v27_v36 = vld [vmem:[%s3166_s1] sm:$0xff]  ;;  %v30_v37 = vld [vmem:[%s3166_s1 + $0x18] sm:$0xff]  ;;  %v28_v38 = vld [vmem:[%s3166_s1 + $0x8] sm:$0xff] }
   0x4   :  { %v2060_v7 = vsub.s32 1, %v2055_v5  ;;  %v3180_v8 = vsub.s32 5, %v2055_v5  ;;  %v2065_v10 = vsub.s32 2, %v2055_v5  ;;  %v3179_v11 = vsub.s32 6, %v2055_v5  ;;  %v40_v39 = vld [vmem:[%s3168_s2 + $0x28] sm:$0xff]  ;;  %v38_v40 = vld [vmem:[%s3168_s2 + $0x18] sm:$0xff] }
   0x5   :  { %v2078_v16 = vsub.s32 0, %v2055_v5  ;;  %v3178_v19 = vsub.s32 4, %v2055_v5  ;;  %v2113_v30 = vsub.s32 3, %v2055_v5  ;;  %v3177_v31 = vsub.s32 7, %v2055_v5  ;;  %v41_v41 = vld [vmem:[%s3168_s2 + $0x30] sm:$0xff]  ;;  %v42_v43 = vld [vmem:[%s3168_s2 + $0x38] sm:$0xff] }
   0x6   :  { %193 = vperm.xlu1 %1943, %v34_v4   ;;  %v1238_v14 = vrot.slane %v1199_v13, %v2060_v7  ;;  %v1242_v15 = vrot.slane %v1199_v13, %v3180_v8  ;;  %v1288_v17 = vrot.slane %v1199_v13, %v2065_v10  ;;  %v1292_v18 = vrot.slane %v1199_v13, %v3179_v11  ;;  %v2156_v42 = vld [vmem:[%s3169_s4 + $0x30] sm:$0xff]  ;;  %v2165_v44 = vld [vmem:[%s3169_s4 + $0x20] sm:$0xff]  ;;  %v2188_v47 = vld [vmem:[%s3169_s4 + $0x28] sm:$0xff] }
   0x7   :  { %1951 = vset.pattern.permute.xlu0 %v3181_v9  ;;  %v1204_v25 = vrot.slane %v1199_v13, %v2078_v16  ;;  %v1208_v26 = vrot.slane %v1199_v13, %v3178_v19  ;;  %v1338_v32 = vrot.slane %v1199_v13, %v2113_v30  ;;  %v1342_v33 = vrot.slane %v1199_v13, %v3177_v31  ;;  %v2171_v45 = vld [vmem:[%s3169_s4 + $0x10] sm:$0xff]  ;;  %v2178_v46 = vld [vmem:[%s3169_s4] sm:$0xff]  ;;  %v2194_v48 = vld [vmem:[%s3169_s4 + $0x18] sm:$0xff] }
   0x8   :  { %271 = vperm.xlu0 %1951, %v33_v1   ;;  %v2086_v20 = vrot.slane %v1238_v14, %v2060_v7  ;;  %v2089_v21 = vrot.slane %v1242_v15, %v2060_v7  ;;  %v2092_v22 = vrot.slane %v1288_v17, %v2065_v10  ;;  %v2098_v24 = vrot.slane %v1292_v18, %v2065_v10  ;;  %v39_v49 = vld [vmem:[%s3168_s2 + $0x20] sm:$0xff]  ;;  %v2204_v50 = vld [vmem:[%s3169_s4 + $0x8] sm:$0xff]  ;;  %v2211_v51 = vld [vmem:[%s3169_s4 + $0x38] sm:$0xff] }
   0x9   :  { %v2106_v27 = vrot.slane %v1204_v25, %v2078_v16  ;;  %v2109_v28 = vrot.slane %v1208_v26, %v2078_v16  ;;  %v2121_v34 = vrot.slane %v1338_v32, %v2113_v30  ;;  %v2124_v35 = vrot.slane %v1342_v33, %v2113_v30  ;;  %3237 = vst [vmem:[#allocation4_spill] sm:$0xff] %v2171_v45  ;;  %v37_v52 = vld [vmem:[%s3168_s2 + $0x10] sm:$0xff]  ;;  %v35_v53 = vld [vmem:[%s3168_s2] sm:$0xff]  ;;  %v36_v54 = vld [vmem:[%s3168_s2 + $0x8] sm:$0xff] }
   0xa   :  { %1944 = vset.pattern.permute.xlu1 %v3181_v9  ;;  %3235 = vst [vmem:[#allocation2_spill] sm:$0xff] %v2092_v22  ;;  %3236 = vst [vmem:[#allocation3_spill] sm:$0xff] %v2098_v24  ;;  %v88_v8 = vld [vmem:[%s3167_s0] sm:$0xff] }
   0xb   :  { %275 = vperm.xlu1 %1944, %v34_v4   ;;  %3238 = vst [vmem:[#allocation5_spill] sm:$0xff] %v2178_v46 }
   0xc   :  { %267 = vperm.xlu0 %1951, %v32_v12  }
   0xf   :  { %1945 = vset.pattern.permute.xlu1 %v3174_v6 }
  0x10   :  { %255 = vperm.xlu0 %1951, %v2049_v2   ;;  %111 = vperm.xlu1 %1945, %v31_v23  }
  0x14   :  { %1955 = vset.pattern.permute.xlu0 %v3176_v29  ;;  %1946 = vset.pattern.permute.xlu1 %v1997_v0 }
  0x15   :  { %353 = vperm.xlu0 %1955, %v33_v1   ;;  %181 = vperm.xlu1 %1946, %v31_v23  }
  0x19   :  { %349 = vperm.xlu0 %1955, %v32_v12   ;;  %185 = vperm.xlu1 %1946, %v32_v12  }
  0x1d   :  { %337 = vperm.xlu0 %1955, %v2049_v2   ;;  %1947 = vset.pattern.permute.xlu1 %v3176_v29 }
  0x1e   :  { %357 = vperm.xlu1 %1947, %v34_v4  }
  0x21   :  { %329 = vperm.xlu0 %1955, %v27_v36  }
  0x22   :  { %1948 = vset.pattern.permute.xlu1 %v3181_v9 }
  0x23   :  { %263 = vperm.xlu1 %1948, %v31_v23  }
  0x25   :  { %1962 = vset.pattern.permute.xlu0 %v3174_v6 }
  0x26   :  { %121 = vperm.xlu0 %1962, %v33_v1  }
  0x27   :  { %1949 = vset.pattern.permute.xlu1 %v3174_v6 }
  0x28   :  { %101 = vperm.xlu1 %1949, %v2049_v2  }
  0x2a   :  { %126 = vperm.xlu0 %1962, %v34_v4  }
  0x2c   :  { %106 = vperm.xlu1 %1949, %v30_v37  }
  0x2e   :  { %116 = vperm.xlu0 %1962, %v32_v12  }
  0x30   :  { %1952 = vset.pattern.permute.xlu1 %v1997_v0 }
  0x31   :  { %177 = vperm.xlu1 %1952, %v30_v37  }
  0x32   :  { %96 = vperm.xlu0 %1962, %v28_v38  }
  0x35   :  { %1953 = vset.pattern.permute.xlu1 %v3176_v29 }
  0x36   :  { %437 = vperm.xlu0 %1962, %v40_v39   ;;  %345 = vperm.xlu1 %1953, %v31_v23  }
  0x3a   :  { %427 = vperm.xlu0 %1962, %v38_v40   ;;  %1954 = vset.pattern.permute.xlu1 %v3174_v6 }
  0x3b   :  { %442 = vperm.xlu1 %1954, %v41_v41  }
  0x3e   :  { %522 = vperm.xlu0 %1962, %v2156_v42  }
  0x3f   :  { %447 = vperm.xlu1 %1954, %v42_v43  }
  0x42   :  { %512 = vperm.xlu0 %1962, %v2165_v44  }
  0x43   :  { %1956 = vset.pattern.permute.xlu1 %v3181_v9 }
  0x44   :  { %259 = vperm.xlu1 %1956, %v30_v37  }
  0x46   :  { %502 = vperm.xlu0 %1962, %v2171_v45  }
  0x48   :  { %1957 = vset.pattern.permute.xlu1 %v3174_v6 }
  0x49   :  { %91 = vperm.xlu1 %1957, %v27_v36  }
  0x4a   :  { %492 = vperm.xlu0 %1962, %v2178_v46  }
  0x4d   :  { %1958 = vset.pattern.permute.xlu1 %v1997_v0 }
  0x4e   :  { %1965 = vset.pattern.permute.xlu0 %v1997_v0  ;;  %165 = vperm.xlu1 %1958, %v27_v36  }
  0x4f   :  { %685 = vperm.xlu0 %1965, %v2156_v42  }
  0x52   :  { %169 = vperm.xlu1 %1958, %v28_v38  }
  0x53   :  { %681 = vperm.xlu0 %1965, %v2188_v47  }
  0x56   :  { %1959 = vset.pattern.permute.xlu1 %v3176_v29 }
  0x57   :  { %673 = vperm.xlu0 %1965, %v2194_v48   ;;  %341 = vperm.xlu1 %1959, %v30_v37  }
  0x5b   :  { %665 = vperm.xlu0 %1965, %v2204_v50   ;;  %1960 = vset.pattern.permute.xlu1 %v3174_v6 }
  0x5c   :  { %432 = vperm.xlu1 %1960, %v39_v49  }
  0x5f   :  { %1968 = vset.pattern.permute.xlu0 %v3181_v9 }
  0x60   :  { %850 = vperm.xlu0 %1968, %v2211_v51   ;;  %1961 = vset.pattern.permute.xlu1 %v3181_v9 }
  0x61   :  { %247 = vperm.xlu1 %1961, %v27_v36  }
  0x64   :  { %830 = vperm.xlu0 %1968, %v2171_v45  }
  0x65   :  { %251 = vperm.xlu1 %1961, %v28_v38  }
  0x68   :  { %822 = vperm.xlu0 %1968, %v2178_v46  }
  0x69   :  { %1963 = vset.pattern.permute.xlu1 %v3176_v29 }
  0x6a   :  { %333 = vperm.xlu1 %1963, %v28_v38  }
  0x6c   :  { %1969 = vset.pattern.permute.xlu0 %v3176_v29 }
  0x6d   :  { %1007 = vperm.xlu0 %1969, %v2156_v42  }
  0x6e   :  { %1964 = vset.pattern.permute.xlu1 %v3174_v6 }
  0x6f   :  { %422 = vperm.xlu1 %1964, %v37_v52  }
  0x71   :  { %1003 = vperm.xlu0 %1969, %v2188_v47  }
  0x73   :  { %412 = vperm.xlu1 %1964, %v35_v53  }
  0x75   :  { %995 = vperm.xlu0 %1969, %v2194_v48  }
  0x77   :  { %417 = vperm.xlu1 %1964, %v36_v54  }
  0x79   :  { %987 = vperm.xlu0 %1969, %v2204_v50  }
  0x7b   :  { %527 = vperm.xlu1 %1964, %v2211_v51  }
  0x7d   :  { %1972 = vset.pattern.permute.xlu0 %v3174_v6  ;;  %v2236_v55 = vpop.permute.xlu1 %189 }
  0x7e   :  { %v2238_v56 = vpop.permute.xlu0 %173  ;;  %v2242_v57 = vmul.f32 %v2086_v20, %v2236_v55  ;;  %v2246_v58 = vmul.f32 %v2089_v21, %v2236_v55 }
  0x7f   :  { %517 = vperm.xlu1 %1964, %v2188_v47   ;;  %v2251_v59 = vmul.f32 %v2086_v20, %v2238_v56  ;;  %v2255_v60 = vmul.f32 %v2089_v21, %v2238_v56 }
  0x81   :  { %v2257_v61 = vpop.permute.xlu1 %193 }
  0x82   :  { %v2261_v62 = vmul.f32 %v2086_v20, %v2257_v61  ;;  %v2265_v63 = vmul.f32 %v2089_v21, %v2257_v61 }
  0x83   :  { %v2267_v1 = vpop.permute.xlu0 %271  ;;  %507 = vperm.xlu1 %1964, %v2194_v48  }
  0x84   :  { %v2272_v2 = vmul.f32 %v2092_v22, %v2267_v1  ;;  %v2276_v3 = vmul.f32 %v2098_v24, %v2267_v1 }
  0x86   :  { %v2278_v4 = vpop.permute.xlu1 %275 }
  0x87   :  { %v2280_v12 = vpop.permute.xlu0 %267  ;;  %v2284_v13 = vmul.f32 %v2092_v22, %v2278_v4  ;;  %v2288_v14 = vmul.f32 %v2098_v24, %v2278_v4  ;;  %497 = vperm.xlu1 %1964, %v2204_v50  }
  0x88   :  { %3239 = vst [vmem:[#allocation6_spill] sm:$0xff] %v2280_v12  ;;  %v2293_v15 = vmul.f32 %v2092_v22, %v2280_v12  ;;  %v2297_v17 = vmul.f32 %v2098_v24, %v2280_v12  ;;  %v199_v12 = vrot.slane %v88_v8, %v2060_v7 }
  0x8b   :  { %v2299_v18 = vpop.permute.xlu0 %255  ;;  %v2301_v23 = vpop.permute.xlu1 %111  ;;  %1966 = vset.pattern.permute.xlu1 %v1997_v0 }
  0x8c   :  { %3240 = vst [vmem:[#allocation7_spill] sm:$0xff] %v2301_v23  ;;  %v2305_v25 = vmul.f32 %v2092_v22, %v2299_v18  ;;  %v2309_v26 = vmul.f32 %v2098_v24, %v2299_v18  ;;  %v1227_v32 = vmul.f32 %v2106_v27, %v2301_v23  ;;  %v1228_v33 = vmul.f32 %v2109_v28, %v2301_v23 }
  0x8d   :  { %689 = vperm.xlu1 %1966, %v2211_v51  }
  0x8e   :  { %3241 = vst [vmem:[#allocation8_spill] sm:$0xff] %v2305_v25  ;;  %3242 = vst [vmem:[#allocation9_spill] sm:$0xff] %v2309_v26 }
  0x90   :  { %v2317_v36 = vpop.permute.xlu0 %353  ;;  %v2319_v37 = vpop.permute.xlu1 %181 }
  0x91   :  { %3243 = vst [vmem:[#allocation10_spill] sm:$0xff] %v2319_v37  ;;  %v2323_v38 = vmul.f32 %v2121_v34, %v2317_v36  ;;  %v2327_v39 = vmul.f32 %v2124_v35, %v2317_v36  ;;  %677 = vperm.xlu1 %1966, %v2165_v44   ;;  %v1261_v0 = vmul.f32 %v2086_v20, %v2319_v37 }
  0x92   :  { %v1262_v40 = vmul.f32 %v2089_v21, %v2319_v37  ;;  %v3253_v37 = vmov 2  }
  0x93   :  { %v1277_v41 = vadd.f32 %v1261_v0, %v1227_v32 }
  0x94   :  { %v1278_v43 = vadd.f32 %v1262_v40, %v1228_v33  ;;  %v2334_v49 = vpop.permute.xlu0 %349  ;;  %v2336_v52 = vpop.permute.xlu1 %185 }
  0x95   :  { %3244 = vst [vmem:[#allocation11_spill] sm:$0xff] %v2334_v49  ;;  %3245 = vst [vmem:[#allocation12_spill] sm:$0xff] %v2336_v52  ;;  %v2340_v53 = vmul.f32 %v2121_v34, %v2334_v49  ;;  %v2344_v54 = vmul.f32 %v2124_v35, %v2334_v49  ;;  %669 = vperm.xlu1 %1966, %v2171_v45   ;;  %v2349_v6 = vmul.f32 %v2086_v20, %v2336_v52 }
  0x96   :  { %v2353_v32 = vmul.f32 %v2089_v21, %v2336_v52  ;;  %v3255_v52 = vsub.s32 5, %v2055_v5  ;;  %v3257_v45 = vsub.s32 4, %v2055_v5 }
  0x98   :  { %v2355_v33 = vpop.permute.xlu0 %337  ;;  %v137_v26 = vrot.slane %v88_v8, %v3257_v45 }
  0x99   :  { %3246 = vst [vmem:[#allocation13_spill] sm:$0xff] %v2355_v33  ;;  %v2359_v0 = vmul.f32 %v2121_v34, %v2355_v33  ;;  %v2363_v40 = vmul.f32 %v2124_v35, %v2355_v33  ;;  %661 = vperm.xlu1 %1966, %v2178_v46   ;;  %v2366_v29 = vpop.permute.xlu1 %357  ;;  %v203_v46 = vrot.slane %v88_v8, %v3255_v52 }
  0x9a   :  { %3249 = vst [vmem:[#allocation16_spill] sm:$0xff] %v2366_v29  ;;  %v2370_v31 = vmul.f32 %v2121_v34, %v2366_v29  ;;  %v2374_v19 = vmul.f32 %v2124_v35, %v2366_v29  ;;  %v2417_v29 = vrot.slane %v199_v12, %v2060_v7  ;;  %v2436_v12 = vrot.slane %v137_v26, %v2078_v16 }
  0x9b   :  { %3247 = vst [vmem:[#allocation14_spill] sm:$0xff] %v2359_v0  ;;  %3248 = vst [vmem:[#allocation15_spill] sm:$0xff] %v2363_v40  ;;  %v2420_v45 = vrot.slane %v203_v46, %v2060_v7 }
  0x9c   :  { %v2376_v11 = vpop.permute.xlu0 %329  ;;  %3259 = vst [vmem:[#allocation21_spill] sm:$0xff] %v2417_v29 }
  0x9d   :  { %3250 = vst [vmem:[#allocation17_spill] sm:$0xff] %v2376_v11  ;;  %v2383_v9 = vmul.f32 %v2121_v34, %v2376_v11  ;;  %v2387_v23 = vmul.f32 %v2124_v35, %v2376_v11  ;;  %1967 = vset.pattern.permute.xlu1 %v3253_v37  ;;  %v281_v11 = vrot.slane %v88_v8, %v2065_v10  ;;  %3260 = vst [vmem:[#allocation22_spill] sm:$0xff] %v2420_v45 }
  0x9e   :  { %846 = vperm.xlu1 %1967, %v2156_v42   ;;  %v2391_v49 = vpop.permute.xlu1 %263  ;;  %v133_v42 = vrot.slane %v88_v8, %v2078_v16  ;;  %v227_v26 = vmul.f32 %v2420_v45, %v2236_v55 }
  0x9f   :  { %3251 = vst [vmem:[#allocation18_spill] sm:$0xff] %v2383_v9  ;;  %3252 = vst [vmem:[#allocation19_spill] sm:$0xff] %v2387_v23  ;;  %v1311_v40 = vmul.f32 %v2092_v22, %v2391_v49  ;;  %v1312_v9 = vmul.f32 %v2098_v24, %v2391_v49  ;;  %v3256_v23 = vsub.s32 6, %v2055_v5  ;;  %v363_v22 = vrot.slane %v88_v8, %v2113_v30 }
  0xa0   :  { %3254 = vst [vmem:[#allocation20_spill] sm:$0xff] %v2391_v49  ;;  %v3258_v49 = vsub.s32 7, %v2055_v5 }
  0xa1   :  { %v285_v37 = vrot.slane %v88_v8, %v3256_v23  ;;  %v122_v0 = vpop.permute.xlu0 %121  ;;  %v2406_v25 = vadd.f32 %v1311_v40, %v1277_v41  ;;  %v2408_v52 = vadd.f32 %v1312_v9, %v1278_v43  ;;  %v2425_v9 = vrot.slane %v281_v11, %v2065_v10 }
  0xa2   :  { %838 = vperm.xlu1 %1967, %v2165_v44   ;;  %v367_v24 = vrot.slane %v88_v8, %v3258_v49  ;;  %v1231_v33 = vmul.f32 %v2106_v27, %v122_v0  ;;  %v1232_v23 = vmul.f32 %v2109_v28, %v122_v0  ;;  %v2433_v40 = vrot.slane %v133_v42, %v2078_v16 }
  0xa3   :  { %v2422_v41 = vpop.permute.xlu1 %101  ;;  %v2428_v43 = vrot.slane %v285_v37, %v2065_v10  ;;  %v2444_v10 = vrot.slane %v363_v22, %v2113_v30  ;;  %v226_v16 = vmul.f32 %v2417_v29, %v2236_v55 }
  0xa4   :  { %v1281_v5 = vadd.f32 %v2242_v57, %v1231_v33  ;;  %v1282_v8 = vadd.f32 %v2246_v58, %v1232_v23  ;;  %v1223_v7 = vmul.f32 %v2106_v27, %v2422_v41  ;;  %v1224_v11 = vmul.f32 %v2109_v28, %v2422_v41 }
  0xa5   :  { %v127_v49 = vpop.permute.xlu0 %126  ;;  %v2447_v46 = vrot.slane %v367_v24, %v2113_v30  ;;  %v218_v24 = vmul.f32 %v2417_v29, %v2238_v56  ;;  %v2467_v30 = vmul.f32 %v2420_v45, %v2238_v56  ;;  %v160_v56 = vmul.f32 %v2433_v40, %v122_v0 }
  0xa6   :  { %842 = vperm.xlu1 %1967, %v2188_v47   ;;  %v1233_v57 = vmul.f32 %v2106_v27, %v127_v49  ;;  %v1234_v58 = vmul.f32 %v2109_v28, %v127_v49  ;;  %v2456_v33 = vadd.f32 %v2251_v59, %v1223_v7  ;;  %v2459_v47 = vadd.f32 %v2255_v60, %v1224_v11 }
  0xa7   :  { %v2461_v22 = vpop.permute.xlu1 %106  ;;  %v228_v59 = vmul.f32 %v2417_v29, %v2257_v61  ;;  %v229_v60 = vmul.f32 %v2420_v45, %v2257_v61  ;;  %v1331_v61 = vadd.f32 %v2272_v2, %v1281_v5  ;;  %v163_v45 = vmul.f32 %v2436_v12, %v127_v49 }
  0xa8   :  { %3261 = vst [vmem:[#allocation23_spill] sm:$0xff] %v2456_v33  ;;  %3262 = vst [vmem:[#allocation24_spill] sm:$0xff] %v2459_v47  ;;  %v1283_v37 = vadd.f32 %v2261_v62, %v1233_v57  ;;  %v1284_v42 = vadd.f32 %v2265_v63, %v1234_v58  ;;  %v1225_v23 = vmul.f32 %v2106_v27, %v2461_v22 }
  0xa9   :  { %3263 = vst [vmem:[#allocation25_spill] sm:$0xff] %v2461_v22  ;;  %v2471_v55 = vpop.permute.xlu0 %116  ;;  %v1226_v7 = vmul.f32 %v2109_v28, %v2461_v22  ;;  %v161_v62 = vmul.f32 %v2436_v12, %v122_v0  ;;  %v1332_v57 = vadd.f32 %v2276_v3, %v1282_v8  ;;  %v308_v2 = vmul.f32 %v2425_v9, %v2267_v1 }
  0xaa   :  { %834 = vperm.xlu1 %1967, %v2194_v48   ;;  %v1229_v63 = vmul.f32 %v2106_v27, %v2471_v55  ;;  %v1230_v11 = vmul.f32 %v2109_v28, %v2471_v55  ;;  %v1333_v58 = vadd.f32 %v2284_v13, %v1283_v37  ;;  %v1334_v22 = vadd.f32 %v2288_v14, %v1284_v42 }
  0xab   :  { %v162_v48 = vmul.f32 %v2433_v40, %v127_v49  ;;  %v309_v3 = vmul.f32 %v2428_v43, %v2267_v1  ;;  %v243_v1 = vadd.f32 %v227_v26, %v161_v62  ;;  %v152_v49 = vmul.f32 %v2433_v40, %v2422_v41 }
  0xac   :  { %v1279_v0 = vadd.f32 %v2349_v6, %v1229_v63  ;;  %v1280_v29 = vadd.f32 %v2353_v32, %v1230_v11  ;;  %v2496_v47 = vpop.permute.xlu1 %177  ;;  %v310_v6 = vmul.f32 %v2425_v9, %v2278_v4  ;;  %v242_v32 = vadd.f32 %v226_v16, %v160_v56 }
  0xad   :  { %3264 = vst [vmem:[#allocation26_spill] sm:$0xff] %v2496_v47  ;;  %v2498_v33 = vpop.permute.xlu0 %96  ;;  %v1259_v13 = vmul.f32 %v2086_v20, %v2496_v47  ;;  %v1260_v14 = vmul.f32 %v2089_v21, %v2496_v47  ;;  %v245_v63 = vadd.f32 %v229_v60, %v163_v45  ;;  %v1382_v26 = vadd.f32 %v2327_v39, %v1332_v57  ;;  %v3267_v57 = vld [vmem:[#allocation16_spill] sm:$0xff] }
  0xae   :  { %3265 = vst [vmem:[#allocation27_spill] sm:$0xff] %v2498_v33  ;;  %826 = vperm.xlu1 %1967, %v2204_v50   ;;  %v2513_v5 = vmul.f32 %v2106_v27, %v2498_v33  ;;  %v2517_v8 = vmul.f32 %v2109_v28, %v2498_v33  ;;  %v244_v50 = vadd.f32 %v228_v59, %v162_v48 }
  0xaf   :  { %v2521_v37 = vadd.f32 %v1259_v13, %v1225_v23  ;;  %v2523_v42 = vadd.f32 %v1260_v14, %v1226_v7  ;;  %v1329_v16 = vadd.f32 %v2293_v15, %v1279_v0  ;;  %v1330_v56 = vadd.f32 %v2297_v17, %v1280_v29  ;;  %v3268_v14 = vld [vmem:[#allocation13_spill] sm:$0xff] }
  0xb0   :  { %v1381_v33 = vadd.f32 %v2323_v38, %v1331_v61  ;;  %v1383_v62 = vadd.f32 %v2370_v31, %v1333_v58  ;;  %v1384_v23 = vadd.f32 %v2374_v19, %v1334_v22  ;;  %v3266_v7 = vmov 3  }
  0xb1   :  { %v2527_v11 = vpop.permute.xlu0 %437  ;;  %v2529_v47 = vpop.permute.xlu1 %345  ;;  %v311_v45 = vmul.f32 %v2428_v43, %v2278_v4  ;;  %v153_v29 = vmul.f32 %v2436_v12, %v2422_v41  ;;  %v1379_v15 = vadd.f32 %v2340_v53, %v1329_v16  ;;  %v1380_v17 = vadd.f32 %v2344_v54, %v1330_v56  ;;  %v3270_v56 = vld [vmem:[#allocation8_spill] sm:$0xff] }
  0xb2   :  { %1970 = vset.pattern.permute.xlu1 %v3266_v7  ;;  %v300_v38 = vmul.f32 %v2425_v9, %v2299_v18  ;;  %v391_v19 = vmul.f32 %v2447_v46, %v2317_v36  ;;  %v1361_v31 = vmul.f32 %v2121_v34, %v2529_v47  ;;  %v1362_v4 = vmul.f32 %v2124_v35, %v2529_v47  ;;  %v3271_v7 = vld [vmem:[#allocation24_spill] sm:$0xff] }
  0xb3   :  { %1011 = vperm.xlu1 %1970, %v2211_v51   ;;  %v390_v39 = vmul.f32 %v2444_v10, %v2317_v36  ;;  %v234_v53 = vadd.f32 %v218_v24, %v152_v49  ;;  %v2554_v54 = vadd.f32 %v1379_v15, %v2527_v11  ;;  %v2557_v51 = vadd.f32 %v1380_v17, %v2527_v11  ;;  %v3273_v15 = vld [vmem:[#allocation4_spill] sm:$0xff] }
  0xb4   :  { %v325_v41 = vadd.f32 %v309_v3, %v243_v1  ;;  %v327_v22 = vadd.f32 %v311_v45, %v245_v63  ;;  %v324_v59 = vadd.f32 %v308_v2, %v242_v32  ;;  %v326_v60 = vadd.f32 %v310_v6, %v244_v50  ;;  %v3272_v45 = vld [vmem:[#allocation9_spill] sm:$0xff] }
  0xb5   :  { %v301_v61 = vmul.f32 %v2428_v43, %v2299_v18  ;;  %v393_v58 = vmul.f32 %v2447_v46, %v3267_v57  ;;  %v235_v48 = vadd.f32 %v2467_v30, %v153_v29  ;;  %v2565_v24 = vadd.f32 %v1361_v31, %v2406_v25 }
  0xb6   :  { %v443_v36 = vpop.permute.xlu1 %442  ;;  %v392_v0 = vmul.f32 %v2444_v10, %v3267_v57  ;;  %v407_v13 = vadd.f32 %v391_v19, %v325_v41  ;;  %v382_v18 = vmul.f32 %v2444_v10, %v3268_v14  ;;  %v383_v6 = vmul.f32 %v2447_v46, %v3268_v14  ;;  %v3277_v14 = vld [vmem:[#allocation2_spill] sm:$0xff] }
  0xb7   :  { %999 = vperm.xlu1 %1970, %v2165_v44   ;;  %v1397_v3 = vadd.f32 %v1381_v33, %v443_v36  ;;  %v1398_v2 = vadd.f32 %v1382_v26, %v443_v36  ;;  %v409_v32 = vadd.f32 %v393_v58, %v327_v22  ;;  %v2575_v30 = vadd.f32 %v1362_v4, %v2408_v52  ;;  %v3269_v33 = vld [vmem:[#allocation23_spill] sm:$0xff] }
  0xb8   :  { %v463_v25 = vadd.f32 %v443_v36, %v407_v13  ;;  %v406_v1 = vadd.f32 %v390_v39, %v324_v59  ;;  %v408_v49 = vadd.f32 %v392_v0, %v326_v60  ;;  %v316_v44 = vadd.f32 %v300_v38, %v234_v53  ;;  %v3274_v59 = vld [vmem:[#allocation14_spill] sm:$0xff] }
  0xb9   :  { %v1413_v50 = vmax.f32 %v1397_v3, 0.0  ;;  %v317_v16 = vadd.f32 %v301_v61, %v235_v48  ;;  %v1323_v26 = vadd.f32 %v3270_v56, %v3269_v33  ;;  %v1324_v29 = vadd.f32 %v3272_v45, %v3271_v7  ;;  %v3275_v61 = vld [vmem:[#allocation15_spill] sm:$0xff]  ;;  %v3282_v7 = vld [vmem:[#allocation22_spill] sm:$0xff] }
  0xba   :  { %v448_v63 = vpop.permute.xlu1 %447  ;;  %v462_v52 = vadd.f32 %v443_v36, %v406_v1  ;;  %v479_v4 = vmax.f32 %v463_v25, 0.0  ;;  %v2582_v39 = vadd.f32 %v382_v18, %v316_v44  ;;  %v1414_v3 = vmax.f32 %v1398_v2, 0.0 }
  0xbb   :  { %991 = vperm.xlu1 %1970, %v3273_v15   ;;  %v1399_v17 = vadd.f32 %v1383_v62, %v448_v63  ;;  %v1400_v19 = vadd.f32 %v1384_v23, %v448_v63  ;;  %v465_v31 = vadd.f32 %v448_v63, %v409_v32  ;;  %v464_v41 = vadd.f32 %v448_v63, %v408_v49  ;;  %v3276_v62 = vld [vmem:[#allocation5_spill] sm:$0xff] }
  0xbc   :  { %v2584_v38 = vadd.f32 %v383_v6, %v317_v16  ;;  %v2587_v60 = vadd.f32 %v3274_v59, %v1323_v26  ;;  %v2590_v57 = vadd.f32 %v3275_v61, %v1324_v29  ;;  %v478_v0 = vmax.f32 %v462_v52, 0.0  ;;  %v3278_v6 = vld [vmem:[#allocation3_spill] sm:$0xff]  ;;  %v3281_v26 = vld [vmem:[#allocation21_spill] sm:$0xff]  ;;  %v3283_v29 = vld [vmem:[#allocation6_spill] sm:$0xff] }
  0xbd   :  { %v1415_v53 = vmax.f32 %v1399_v17, 0.0  ;;  %v481_v22 = vmax.f32 %v465_v31, 0.0  ;;  %v480_v58 = vmax.f32 %v464_v41, 0.0  ;;  %v1416_v48 = vmax.f32 %v1400_v19, 0.0  ;;  %v3284_v41 = vld [vmem:[#allocation11_spill] sm:$0xff] }
  0xbe   :  { %v3279_v63 = vmov 0   ;;  %v159_v16 = vmul.f32 %v2436_v12, %v2471_v55  ;;  %v306_v15 = vmul.f32 %v2425_v9, %v3283_v29  ;;  %v307_v17 = vmul.f32 %v2428_v43, %v3283_v29 }
  0xbf   :  { %983 = vperm.xlu1 %1970, %v3276_v62   ;;  %v2593_v23 = vpop.permute.xlu1 %259  ;;  %v489_v36 = vpack.c.bf16 %v481_v22, %v479_v4  ;;  %v2595_v13 = vpack.c.bf16 %v1415_v53, %v1413_v50  ;;  %v488_v25 = vpack.c.bf16 %v480_v58, %v478_v0  ;;  %v2601_v1 = vpack.c.bf16 %v1416_v48, %v1414_v3  ;;  %v3285_v48 = vld [vmem:[#allocation10_spill] sm:$0xff] }
  0xc0   :  { %v1309_v18 = vmul.f32 %v3277_v14, %v2593_v23  ;;  %v1310_v32 = vmul.f32 %v3278_v6, %v2593_v23  ;;  %v158_v50 = vmul.f32 %v2433_v40, %v2471_v55  ;;  %v388_v53 = vmul.f32 %v2444_v10, %v3284_v41 }
  0xc1   :  { %571 = vmatprep.subr.bf16.mxu0 %v489_v36  ;;  %v389_v22 = vmul.f32 %v2447_v46, %v3284_v41  ;;  %v222_v62 = vmul.f32 %v3281_v26, %v3285_v48  ;;  %v223_v36 = vmul.f32 %v3282_v7, %v3285_v48  ;;  %v386_v29 = vmul.f32 %v2444_v10, %v2529_v47  ;;  %v3288_v48 = vld [vmem:[#allocation26_spill] sm:$0xff] }
  0xc2   :  { %v1325_v49 = vadd.f32 %v1309_v18, %v2521_v37  ;;  %v1326_v44 = vadd.f32 %v1310_v32, %v2523_v42  ;;  %572 = vmatpush1.bf16.msra.mxu0 %v488_v25  ;;  %v3280_v37 = vld [vmem:[#allocation12_spill] sm:$0xff]  ;;  %v3286_v18 = vld [vmem:[#allocation7_spill] sm:$0xff] }
  0xc3   :  { %1971 = vset.pattern.permute.xlu1 %v3279_v63  ;;  %v224_v42 = vmul.f32 %v3281_v26, %v3280_v37  ;;  %v225_v45 = vmul.f32 %v3282_v7, %v3280_v37  ;;  %v156_v32 = vmul.f32 %v2433_v40, %v3286_v18  ;;  %v157_v25 = vmul.f32 %v2436_v12, %v3286_v18 }
  0xc4   :  { %v2606_v2 = vpop.permute.xlu1 %91 }
  0xc5   :  { %v1219_v33 = vmul.f32 %v2106_v27, %v2606_v2  ;;  %v1220_v56 = vmul.f32 %v2109_v28, %v2606_v2  ;;  %v240_v19 = vadd.f32 %v224_v42, %v158_v50  ;;  %v241_v55 = vadd.f32 %v225_v45, %v159_v16  ;;  %v3287_v50 = vld [vmem:[#allocation20_spill] sm:$0xff] }
  0xc6   :  { %v304_v16 = vmul.f32 %v2425_v9, %v3287_v50  ;;  %v238_v42 = vadd.f32 %v222_v62, %v156_v32  ;;  %v239_v45 = vadd.f32 %v223_v36, %v157_v25  ;;  %v221_v62 = vmul.f32 %v3282_v7, %v3288_v48 }
  0xc7   :  { %v322_v59 = vadd.f32 %v306_v15, %v240_v19  ;;  %v323_v61 = vadd.f32 %v307_v17, %v241_v55  ;;  %v387_v15 = vmul.f32 %v2447_v46, %v2529_v47  ;;  %v220_v47 = vmul.f32 %v3281_v26, %v3288_v48 }
  0xc8   :  { %v1411_v32 = vmax.f32 %v2554_v54, 0.0  ;;  %v303_v54 = vmul.f32 %v2428_v43, %v2593_v23 }
  0xc9   :  { %v2624_v31 = vpop.permute.xlu1 %165  ;;  %v404_v37 = vadd.f32 %v388_v53, %v322_v59 }
  0xca   :  { %v1253_v27 = vmul.f32 %v2086_v20, %v2624_v31  ;;  %v1254_v28 = vmul.f32 %v2089_v21, %v2624_v31 }
  0xcc   :  { %v2630_v52 = vadd.f32 %v1253_v27, %v1219_v33  ;;  %v2632_v4 = vadd.f32 %v1254_v28, %v1220_v56  ;;  %v305_v33 = vmul.f32 %v2428_v43, %v3287_v50 }
  0xcd   :  { %v2638_v58 = vpop.permute.xlu1 %169 }
  0xce   :  { %v1255_v0 = vmul.f32 %v2086_v20, %v2638_v58  ;;  %v1256_v3 = vmul.f32 %v2089_v21, %v2638_v58  ;;  %v405_v21 = vadd.f32 %v389_v22, %v323_v61  ;;  %v321_v27 = vadd.f32 %v305_v33, %v239_v45  ;;  %v2670_v22 = vpop.permute.xlu0 %427  ;;  %v3289_v45 = vld [vmem:[#allocation25_spill] sm:$0xff] }
  0xd0   :  { %v2657_v56 = vadd.f32 %v1255_v0, %v2513_v5  ;;  %v2660_v20 = vadd.f32 %v1256_v3, %v2517_v8  ;;  %v320_v5 = vadd.f32 %v304_v16, %v238_v42  ;;  %v460_v8 = vadd.f32 %v2527_v11, %v404_v37 }
  0xd1   :  { %v461_v28 = vadd.f32 %v2527_v11, %v405_v21  ;;  %v403_v61 = vadd.f32 %v387_v15, %v321_v27  ;;  %v1412_v16 = vmax.f32 %v2557_v51, 0.0  ;;  %v155_v15 = vmul.f32 %v2436_v12, %v3289_v45 }
  0xd2   :  { %v342_v17 = vpop.permute.xlu1 %341  ;;  %v402_v59 = vadd.f32 %v386_v29, %v320_v5  ;;  %v476_v50 = vmax.f32 %v460_v8, 0.0  ;;  %v154_v29 = vmul.f32 %v2433_v40, %v3289_v45 }
  0xd3   :  { %v1359_v19 = vmul.f32 %v2121_v34, %v342_v17  ;;  %v1360_v55 = vmul.f32 %v2124_v35, %v342_v17  ;;  %v477_v25 = vmax.f32 %v461_v28, 0.0 }
  0xd4   :  { %v236_v28 = vadd.f32 %v220_v47, %v154_v29  ;;  %v215_v47 = vmul.f32 %v3282_v7, %v2624_v31 }
  0xd5   :  { %v1375_v41 = vadd.f32 %v1359_v19, %v1325_v49  ;;  %v1376_v53 = vadd.f32 %v1360_v55, %v1326_v44 }
  0xd7   :  { %v2677_v36 = vadd.f32 %v1375_v41, %v2670_v22  ;;  %v433_v0 = vpop.permute.xlu1 %432  ;;  %v2680_v3 = vadd.f32 %v1376_v53, %v2670_v22  ;;  %v237_v41 = vadd.f32 %v221_v62, %v155_v15  ;;  %v384_v53 = vmul.f32 %v2444_v10, %v342_v17 }
  0xd8   :  { %v458_v11 = vadd.f32 %v433_v0, %v402_v59  ;;  %v459_v49 = vadd.f32 %v433_v0, %v403_v61  ;;  %v1393_v44 = vadd.f32 %v2565_v24, %v433_v0  ;;  %v1394_v18 = vadd.f32 %v2575_v30, %v433_v0 }
  0xd9   :  { %v302_v24 = vmul.f32 %v2425_v9, %v2593_v23  ;;  %v385_v59 = vmul.f32 %v2447_v46, %v342_v17  ;;  %v319_v0 = vadd.f32 %v303_v54, %v237_v41  ;;  %v216_v15 = vmul.f32 %v3281_v26, %v2638_v58 }
  0xda   :  { %v1409_v33 = vmax.f32 %v1393_v44, 0.0  ;;  %v475_v37 = vmax.f32 %v459_v49, 0.0  ;;  %v474_v21 = vmax.f32 %v458_v11, 0.0  ;;  %v1410_v42 = vmax.f32 %v1394_v18, 0.0 }
  0xdb   :  { %v318_v48 = vadd.f32 %v302_v24, %v236_v28  ;;  %v214_v49 = vmul.f32 %v3281_v26, %v2624_v31  ;;  %v401_v18 = vadd.f32 %v385_v59, %v319_v0 }
  0xdc   :  { %v248_v30 = vpop.permute.xlu1 %247  ;;  %v487_v19 = vpack.c.bf16 %v477_v25, %v475_v37  ;;  %v486_v55 = vpack.c.bf16 %v476_v50, %v474_v21  ;;  %v2694_v51 = vpack.c.bf16 %v1412_v16, %v1410_v42  ;;  %v2696_v5 = vpack.c.bf16 %v1411_v32, %v1409_v33  ;;  %v3290_v32 = vld [vmem:[#allocation18_spill] sm:$0xff]  ;;  %v3291_v25 = vld [vmem:[#allocation19_spill] sm:$0xff] }
  0xdd   :  { %v1303_v27 = vmul.f32 %v3277_v14, %v248_v30  ;;  %v1304_v8 = vmul.f32 %v3278_v6, %v248_v30  ;;  %v400_v17 = vadd.f32 %v384_v53, %v318_v48  ;;  %v148_v50 = vmul.f32 %v2433_v40, %v2606_v2  ;;  %v3292_v37 = vld [vmem:[#allocation27_spill] sm:$0xff] }
  0xde   :  { %573 = vmatprep.subr.bf16.mxu0 %v487_v19  ;;  %v149_v16 = vmul.f32 %v2436_v12, %v2606_v2  ;;  %v296_v21 = vmul.f32 %v2425_v9, %v248_v30  ;;  %v297_v42 = vmul.f32 %v2428_v43, %v248_v30  ;;  %v217_v2 = vmul.f32 %v3282_v7, %v2638_v58 }
  0xdf   :  { %v1319_v23 = vadd.f32 %v1303_v27, %v2630_v52  ;;  %v1320_v61 = vadd.f32 %v1304_v8, %v2632_v4  ;;  %574 = vmatpush1.bf16.msra.mxu0 %v486_v55  ;;  %v230_v45 = vadd.f32 %v214_v49, %v148_v50  ;;  %v457_v24 = vadd.f32 %v2670_v22, %v401_v18  ;;  %v3293_v27 = vld [vmem:[#allocation17_spill] sm:$0xff] }
  0xe0   :  { %v252_v11 = vpop.permute.xlu1 %251  ;;  %v231_v29 = vadd.f32 %v215_v47, %v149_v16  ;;  %v378_v8 = vmul.f32 %v2444_v10, %v3293_v27  ;;  %v379_v26 = vmul.f32 %v2447_v46, %v3293_v27 }
  0xe1   :  { %v1305_v62 = vmul.f32 %v3277_v14, %v252_v11  ;;  %v1306_v44 = vmul.f32 %v3278_v6, %v252_v11  ;;  %v1369_v52 = vadd.f32 %v3290_v32, %v1319_v23  ;;  %v1370_v4 = vadd.f32 %v3291_v25, %v1320_v61 }
  0xe2   :  { %v150_v14 = vmul.f32 %v2433_v40, %v3292_v37  ;;  %v151_v6 = vmul.f32 %v2436_v12, %v3292_v37  ;;  %v456_v12 = vadd.f32 %v2670_v22, %v400_v17  ;;  %v312_v54 = vadd.f32 %v296_v21, %v230_v45 }
  0xe3   :  { %v1321_v33 = vadd.f32 %v1305_v62, %v2657_v56  ;;  %v1322_v31 = vadd.f32 %v1306_v44, %v2660_v20  ;;  %v313_v19 = vadd.f32 %v297_v42, %v231_v29  ;;  %v473_v41 = vmax.f32 %v457_v24, 0.0 }
  0xe4   :  { %v232_v7 = vadd.f32 %v216_v15, %v150_v14  ;;  %v233_v58 = vadd.f32 %v217_v2, %v151_v6  ;;  %v472_v53 = vmax.f32 %v456_v12, 0.0  ;;  %v394_v49 = vadd.f32 %v378_v8, %v312_v54  ;;  %v2757_v12 = vld [vmem:[%s3170_s3] sm:$0xff]   ;;  %v2765_v54 = vld [vmem:[%s3170_s3 + $0x8] sm:$0xff]  }
  0xe5   :  { %v334_v56 = vpop.permute.xlu1 %333  ;;  %v395_v47 = vadd.f32 %v379_v26, %v313_v19  ;;  %v2773_v19 = vld [vmem:[%s3170_s3 + $0x10] sm:$0xff]  }
  0xe6   :  { %v1355_v20 = vmul.f32 %v2121_v34, %v334_v56  ;;  %v1356_v40 = vmul.f32 %v2124_v35, %v334_v56  ;;  %v298_v34 = vmul.f32 %v2425_v9, %v252_v11  ;;  %v299_v35 = vmul.f32 %v2428_v43, %v252_v11 }
  0xe7   :  { %v380_v48 = vmul.f32 %v2444_v10, %v334_v56  ;;  %v381_v0 = vmul.f32 %v2447_v46, %v334_v56 }
  0xe8   :  { %v1371_v30 = vadd.f32 %v1355_v20, %v1321_v33  ;;  %v1372_v55 = vadd.f32 %v1356_v40, %v1322_v31  ;;  %v314_v44 = vadd.f32 %v298_v34, %v232_v7  ;;  %v315_v17 = vadd.f32 %v299_v35, %v233_v58 }
  0xea   :  { %v423_v28 = vpop.permute.xlu1 %422  ;;  %v396_v33 = vadd.f32 %v380_v48, %v314_v44  ;;  %v397_v31 = vadd.f32 %v381_v0, %v315_v17 }
  0xeb   :  { %v454_v22 = vadd.f32 %v423_v28, %v2582_v39  ;;  %v455_v59 = vadd.f32 %v423_v28, %v2584_v38  ;;  %v1389_v23 = vadd.f32 %v2587_v60, %v423_v28  ;;  %v1390_v61 = vadd.f32 %v2590_v57, %v423_v28 }
  0xec   :  { %v1408_v39 = vmax.f32 %v2680_v3, 0.0  ;;  %v1407_v38 = vmax.f32 %v2677_v36, 0.0 }
  0xed   :  { %v1405_v9 = vmax.f32 %v1389_v23, 0.0  ;;  %v471_v62 = vmax.f32 %v455_v59, 0.0  ;;  %v470_v43 = vmax.f32 %v454_v22, 0.0  ;;  %v1406_v11 = vmax.f32 %v1390_v61, 0.0  ;;  %v2788_v22 = vpop.permute.xlu0 %522 }
  0xee   :  { %v413_v18 = vpop.permute.xlu1 %412 }
  0xef   :  { %v450_v60 = vadd.f32 %v413_v18, %v394_v49  ;;  %v451_v32 = vadd.f32 %v413_v18, %v395_v47  ;;  %v1385_v57 = vadd.f32 %v1369_v52, %v413_v18  ;;  %v1386_v25 = vadd.f32 %v1370_v4, %v413_v18 }
  0xf0   :  { %v485_v10 = vpack.c.bf16 %v473_v41, %v471_v62  ;;  %v484_v50 = vpack.c.bf16 %v472_v53, %v470_v43  ;;  %v2746_v46 = vpack.c.bf16 %v1408_v39, %v1406_v11  ;;  %v2748_v16 = vpack.c.bf16 %v1407_v38, %v1405_v9 }
  0xf1   :  { %v1401_v36 = vmax.f32 %v1385_v57, 0.0  ;;  %v467_v42 = vmax.f32 %v451_v32, 0.0  ;;  %v466_v45 = vmax.f32 %v450_v60, 0.0  ;;  %v1402_v52 = vmax.f32 %v1386_v25, 0.0  ;;  %v2792_v0 = vpop.permute.xlu0 %512 }
  0xf2   :  { %575 = vmatprep.subr.bf16.mxu0 %v485_v10  ;;  %v418_v37 = vpop.permute.xlu1 %417 }
  0xf3   :  { %v452_v14 = vadd.f32 %v418_v37, %v396_v33  ;;  %v453_v6 = vadd.f32 %v418_v37, %v397_v31  ;;  %v1387_v21 = vadd.f32 %v1371_v30, %v418_v37  ;;  %v1388_v3 = vadd.f32 %v1372_v55, %v418_v37  ;;  %576 = vmatpush1.bf16.msra.mxu0 %v484_v50  ;;  %v2781_v30 = vld [vmem:[%s3170_s3 + $0x18] sm:$0xff]  }
  0xf5   :  { %v1403_v4 = vmax.f32 %v1387_v21, 0.0  ;;  %v469_v29 = vmax.f32 %v453_v6, 0.0  ;;  %v468_v15 = vmax.f32 %v452_v14, 0.0  ;;  %v1404_v2 = vmax.f32 %v1388_v3, 0.0  ;;  %v2802_v38 = vpop.permute.xlu0 %502 }
  0xf6   :  { %v2786_v41 = vpop.permute.xlu1 %527 }
  0xf7   :  { %v483_v56 = vpack.c.bf16 %v469_v29, %v467_v42  ;;  %v482_v20 = vpack.c.bf16 %v468_v15, %v466_v45  ;;  %v2750_v40 = vpack.c.bf16 %v1404_v2, %v1402_v52  ;;  %v2752_v24 = vpack.c.bf16 %v1403_v4, %v1401_v36 }
  0xf9   :  { %577 = vmatprep.subr.bf16.mxu0 %v483_v56  ;;  %v2812_v29 = vpop.permute.xlu0 %492 }
  0xfa   :  { %578 = vmatpush1.bf16.msra.mxu0 %v482_v20  ;;  %v2790_v61 = vpop.permute.xlu1 %517 }
  0xfd   :  { %1893 = vmatmul.mubr.msk.bf16.vlgmr.msra.gmra.mxu0 %vm550_vm0, %v2757_v12 }
  0xfe   :  { %605 = vmatprep.mubr.bf16.mxu0 %v3279_v63  ;;  %v2797_v11 = vpop.permute.xlu1 %507 }
 0x102   :  { %v2808_v21 = vpop.permute.xlu1 %497 }
 0x105   :  { %1894 = vmatmul.mubr.msk.bf16.gmra.mxu0 %vm550_vm0, %v2765_v54 }
 0x106   :  { %615 = vmatprep.mubr.bf16.mxu0 %v3279_v63 }
 0x10d   :  { %1895 = vmatmul.mubr.msk.bf16.gmra.mxu0 %vm550_vm0, %v2773_v19 }
 0x10e   :  { %625 = vmatprep.mubr.bf16.mxu0 %v3279_v63 }
 0x115   :  { %1896 = vmatmul.mubr.msk.bf16.gmra.mxu0 %vm550_vm0, %v2781_v30 }
 0x116   :  { %917 = vmatprep.mubr.bf16.mxu0 %v3279_v63 }
 0x1bd   :  { %v597_v55 = vpop.f32.mrf.mxu0 }
 0x1bf   :  { %v599_v27 = vpop.f32.mrf.mxu0 }
 0x1c0   :  { %v600_v56 = vadd.f32 %v599_v27, %v2812_v29 }
 0x1c1   :  { %v601_v8 = vpop.f32.mrf.mxu0 }
 0x1c3   :  { %v603_v26 = vpop.f32.mrf.mxu0 }
 0x1c4   :  { %v604_v45 = vadd.f32 %v603_v26, %v2808_v21  ;;  %v598_v26 = vadd.f32 %v597_v55, %v2812_v29  ;;  %v2829_v55 = vld [vmem:[%s3170_s3 + $0x28] sm:$0xff]  }
 0x1c5   :  { %v607_v7 = vpop.f32.mrf.mxu0 }
 0x1c6   :  { %v608_v15 = vadd.f32 %v607_v7, %v2802_v38 }
 0x1c7   :  { %v609_v58 = vpop.f32.mrf.mxu0 }
 0x1c8   :  { %v610_v37 = vadd.f32 %v609_v58, %v2802_v38  ;;  %v602_v58 = vadd.f32 %v601_v8, %v2808_v21  ;;  %v2821_v8 = vld [vmem:[%s3170_s3 + $0x20] sm:$0xff]  }
 0x1c9   :  { %v611_v34 = vpop.f32.mrf.mxu0 }
 0x1ca   :  { %v612_v3 = vadd.f32 %v611_v34, %v2797_v11  ;;  %v641_v20 = vmax.f32 %v610_v37, 0.0 }
 0x1cb   :  { %v613_v35 = vpop.f32.mrf.mxu0 }
 0x1cc   :  { %v614_v57 = vadd.f32 %v613_v35, %v2797_v11  ;;  %v642_v34 = vmax.f32 %v612_v3, 0.0 }
 0x1cd   :  { %v617_v28 = vpop.f32.mrf.mxu0 }
 0x1ce   :  { %v618_v33 = vadd.f32 %v617_v28, %v2792_v0  ;;  %v643_v52 = vmax.f32 %v614_v57, 0.0  ;;  %v639_v28 = vmax.f32 %v604_v45, 0.0 }
 0x1cf   :  { %v619_v53 = vpop.f32.mrf.mxu0 }
 0x1d0   :  { %v620_v18 = vadd.f32 %v619_v53, %v2792_v0  ;;  %v644_v2 = vmax.f32 %v618_v33, 0.0  ;;  %v655_v53 = vpack.c.bf16 %v643_v52, %v641_v20  ;;  %v2852_v33 = vpop.permute.xlu1 %689 }
 0x1d1   :  { %v621_v59 = vpop.f32.mrf.mxu0 }
 0x1d2   :  { %v622_v60 = vadd.f32 %v621_v59, %v2790_v61  ;;  %v645_v14 = vmax.f32 %v620_v18, 0.0  ;;  %v640_v59 = vmax.f32 %v608_v15, 0.0 }
 0x1d3   :  { %v623_v23 = vpop.f32.mrf.mxu0 }
 0x1d4   :  { %v624_v9 = vadd.f32 %v623_v23, %v2790_v61  ;;  %v646_v36 = vmax.f32 %v622_v60, 0.0  ;;  %v637_v23 = vmax.f32 %v600_v56, 0.0  ;;  %v654_v7 = vpack.c.bf16 %v642_v34, %v640_v59  ;;  %v2856_v3 = vpop.permute.xlu1 %677 }
 0x1d5   :  { %v627_v48 = vpop.f32.mrf.mxu0 }
 0x1d6   :  { %v628_v44 = vadd.f32 %v627_v48, %v2788_v22  ;;  %v647_v25 = vmax.f32 %v624_v9, 0.0  ;;  %v656_v35 = vpack.c.bf16 %v646_v36, %v644_v2  ;;  %v638_v48 = vmax.f32 %v602_v58, 0.0  ;;  %v2837_v9 = vld [vmem:[%s3170_s3 + $0x30] sm:$0xff]  }
 0x1d7   :  { %v629_v49 = vpop.f32.mrf.mxu0 }
 0x1d8   :  { %v630_v62 = vadd.f32 %v629_v49, %v2788_v22  ;;  %v648_v31 = vmax.f32 %v628_v44, 0.0  ;;  %v657_v4 = vpack.c.bf16 %v647_v25, %v645_v14  ;;  %v653_v49 = vpack.c.bf16 %v639_v28, %v637_v23  ;;  %v2866_v34 = vpop.permute.xlu1 %669 }
 0x1d9   :  { %v631_v47 = vpop.f32.mrf.mxu0  ;;  %3295 = vst [vmem:[#allocation13_spill] sm:$0xff] %v2866_v34 }
 0x1da   :  { %v632_v43 = vadd.f32 %v631_v47, %v2786_v41  ;;  %v649_v10 = vmax.f32 %v630_v62, 0.0  ;;  %v636_v47 = vmax.f32 %v598_v26, 0.0  ;;  %v2845_v62 = vld [vmem:[%s3170_s3 + $0x38] sm:$0xff]  }
 0x1db   :  { %v633_v17 = vpop.f32.mrf.mxu0 }
 0x1dc   :  { %v634_v39 = vadd.f32 %v633_v17, %v2786_v41  ;;  %v650_v32 = vmax.f32 %v632_v43, 0.0  ;;  %v652_v27 = vpack.c.bf16 %v638_v48, %v636_v47 }
 0x1de   :  { %v651_v50 = vmax.f32 %v634_v39, 0.0  ;;  %v658_v42 = vpack.c.bf16 %v650_v32, %v648_v31 }
 0x1e0   :  { %v659_v6 = vpack.c.bf16 %v651_v50, %v649_v10  ;;  %v2850_v10 = vpop.permute.xlu0 %685 }
 0x1e2   :  { %732 = vmatprep.subr.bf16.mxu1 %v659_v6 }
 0x1e3   :  { %733 = vmatpush1.bf16.msra.mxu1 %v658_v42 }
 0x1e4   :  { %734 = vmatprep.subr.bf16.mxu1 %v657_v4  ;;  %v2854_v14 = vpop.permute.xlu0 %681 }
 0x1e7   :  { %735 = vmatpush1.bf16.msra.mxu1 %v656_v35 }
 0x1e8   :  { %736 = vmatprep.subr.bf16.mxu1 %v655_v53  ;;  %v2861_v15 = vpop.permute.xlu0 %673 }
 0x1e9   :  { %3294 = vst [vmem:[#allocation16_spill] sm:$0xff] %v2861_v15 }
 0x1eb   :  { %737 = vmatpush1.bf16.msra.mxu1 %v654_v7 }
 0x1ec   :  { %738 = vmatprep.subr.bf16.mxu1 %v653_v49 }
 0x1ef   :  { %739 = vmatpush1.bf16.msra.mxu1 %v652_v27 }
 0x1f2   :  { %1901 = vmatmul.mubr.msk.bf16.vlgmr.msra.gmra.mxu1 %vm550_vm0, %v2821_v8 }
 0x1f3   :  { %766 = vmatprep.mubr.bf16.mxu1 %v3279_v63 }
 0x1fa   :  { %1902 = vmatmul.mubr.msk.bf16.gmra.mxu1 %vm550_vm0, %v2829_v55 }
 0x1fb   :  { %776 = vmatprep.mubr.bf16.mxu1 %v3279_v63 }
 0x202   :  { %1903 = vmatmul.mubr.msk.bf16.gmra.mxu1 %vm550_vm0, %v2837_v9 }
 0x203   :  { %786 = vmatprep.mubr.bf16.mxu1 %v3279_v63 }
 0x20a   :  { %1904 = vmatmul.mubr.msk.bf16.gmra.mxu1 %vm550_vm0, %v2845_v62 }
 0x20b   :  { %1078 = vmatprep.mubr.bf16.mxu1 %v3279_v63 }
 0x2b2   :  { %v758_v43 = vpop.f32.mrf.mxu1 }
 0x2b4   :  { %v760_v44 = vpop.f32.mrf.mxu1 }
 0x2b6   :  { %v762_v17 = vpop.f32.mrf.mxu1 }
 0x2b8   :  { %v764_v18 = vpop.f32.mrf.mxu1 }
 0x2ba   :  { %v768_v39 = vpop.f32.mrf.mxu1 }
 0x2bc   :  { %v770_v60 = vpop.f32.mrf.mxu1 }
 0x2bd   :  { %v771_v49 = vadd.f32 %v770_v60, %v2866_v34 }
 0x2be   :  { %v772_v32 = vpop.f32.mrf.mxu1 }
 0x2c0   :  { %v774_v57 = vpop.f32.mrf.mxu1 }
 0x2c1   :  { %v775_v53 = vadd.f32 %v774_v57, %v2861_v15 }
 0x2c2   :  { %v778_v25 = vpop.f32.mrf.mxu1 }
 0x2c3   :  { %v779_v48 = vadd.f32 %v778_v25, %v2856_v3  ;;  %v769_v25 = vadd.f32 %v768_v39, %v2866_v34 }
 0x2c4   :  { %v780_v50 = vpop.f32.mrf.mxu1 }
 0x2c5   :  { %v781_v20 = vadd.f32 %v780_v50, %v2856_v3  ;;  %v2872_v50 = vpop.permute.xlu0 %665 }
 0x2c6   :  { %v782_v31 = vpop.f32.mrf.mxu1  ;;  %3296 = vst [vmem:[#allocation23_spill] sm:$0xff] %v2872_v50 }
 0x2c7   :  { %v783_v35 = vadd.f32 %v782_v31, %v2854_v14  ;;  %v806_v47 = vmax.f32 %v781_v20, 0.0  ;;  %v765_v31 = vadd.f32 %v764_v18, %v2872_v50 }
 0x2c8   :  { %v784_v37 = vpop.f32.mrf.mxu1 }
 0x2c9   :  { %v785_v45 = vadd.f32 %v784_v37, %v2854_v14  ;;  %v773_v37 = vadd.f32 %v772_v32, %v2861_v15  ;;  %v800_v20 = vmax.f32 %v765_v31, 0.0 }
 0x2ca   :  { %v788_v6 = vpop.f32.mrf.mxu1 }
 0x2cb   :  { %v789_v2 = vadd.f32 %v788_v6, %v2850_v10  ;;  %v808_v26 = vmax.f32 %v785_v45, 0.0  ;;  %v807_v6 = vmax.f32 %v783_v35, 0.0  ;;  %v2876_v45 = vpop.permute.xlu1 %661  ;;  %v803_v32 = vmax.f32 %v773_v37, 0.0 }
 0x2cc   :  { %v790_v36 = vpop.f32.mrf.mxu1  ;;  %3297 = vst [vmem:[#allocation8_spill] sm:$0xff] %v2876_v45  ;;  %v761_v60 = vadd.f32 %v760_v44, %v2876_v45  ;;  %v759_v18 = vadd.f32 %v758_v43, %v2876_v45  ;;  %v801_v35 = vmax.f32 %v769_v25, 0.0  ;;  %v2893_v43 = vld [vmem:[%s3170_s3 + $0x48] sm:$0xff]  }
 0x2cd   :  { %v791_v52 = vadd.f32 %v790_v36, %v2850_v10  ;;  %v809_v7 = vmax.f32 %v789_v2, 0.0  ;;  %v818_v57 = vpack.c.bf16 %v808_v26, %v806_v47  ;;  %v763_v2 = vadd.f32 %v762_v17, %v2872_v50  ;;  %v2885_v17 = vld [vmem:[%s3170_s3 + $0x40] sm:$0xff]   ;;  %3299 = vst [vmem:[#allocation9_spill] sm:$0xff] %v2893_v43 }
 0x2ce   :  { %v792_v42 = vpop.f32.mrf.mxu1  ;;  %v815_v39 = vpack.c.bf16 %v803_v32, %v801_v35  ;;  %3298 = vst [vmem:[#allocation24_spill] sm:$0xff] %v2885_v17 }
 0x2cf   :  { %v793_v4 = vadd.f32 %v792_v42, %v2852_v33  ;;  %v810_v59 = vmax.f32 %v791_v52, 0.0  ;;  %v804_v42 = vmax.f32 %v775_v53, 0.0  ;;  %v805_v52 = vmax.f32 %v779_v48, 0.0  ;;  %v2909_v48 = vld [vmem:[%s3170_s3 + $0x58] sm:$0xff]  }
 0x2d0   :  { %v794_v56 = vpop.f32.mrf.mxu1  ;;  %v799_v53 = vmax.f32 %v763_v2, 0.0  ;;  %3301 = vst [vmem:[#allocation14_spill] sm:$0xff] %v2909_v48 }
 0x2d1   :  { %v795_v58 = vadd.f32 %v794_v56, %v2852_v33  ;;  %v811_v28 = vmax.f32 %v793_v4, 0.0  ;;  %v802_v4 = vmax.f32 %v771_v49, 0.0  ;;  %v817_v56 = vpack.c.bf16 %v807_v6, %v805_v52 }
 0x2d3   :  { %v812_v23 = vmax.f32 %v795_v58, 0.0  ;;  %v819_v36 = vpack.c.bf16 %v811_v28, %v809_v7  ;;  %v816_v58 = vpack.c.bf16 %v804_v42, %v802_v4  ;;  %v798_v28 = vmax.f32 %v761_v60, 0.0 }
 0x2d5   :  { %v820_v27 = vpack.c.bf16 %v812_v23, %v810_v59  ;;  %v814_v26 = vpack.c.bf16 %v800_v20, %v798_v28  ;;  %v797_v59 = vmax.f32 %v759_v18, 0.0  ;;  %v2901_v23 = vld [vmem:[%s3170_s3 + $0x50] sm:$0xff]  }
 0x2d6   :  { %3300 = vst [vmem:[#allocation4_spill] sm:$0xff] %v2901_v23 }
 0x2d7   :  { %893 = vmatprep.subr.bf16.mxu0 %v820_v27  ;;  %v813_v44 = vpack.c.bf16 %v799_v53, %v797_v59 }
 0x2d8   :  { %894 = vmatpush1.bf16.msra.mxu0 %v819_v36  ;;  %v2914_v36 = vpop.permute.xlu1 %846 }
 0x2d9   :  { %895 = vmatprep.subr.bf16.mxu0 %v818_v57  ;;  %3302 = vst [vmem:[#allocation15_spill] sm:$0xff] %v2914_v36 }
 0x2dc   :  { %896 = vmatpush1.bf16.msra.mxu0 %v817_v56  ;;  %v2916_v25 = vpop.permute.xlu1 %838  ;;  %v2920_v56 = vpop.permute.xlu0 %850 }
 0x2dd   :  { %897 = vmatprep.subr.bf16.mxu0 %v816_v58  ;;  %3303 = vst [vmem:[#allocation5_spill] sm:$0xff] %v2920_v56 }
 0x2e0   :  { %898 = vmatpush1.bf16.msra.mxu0 %v815_v39  ;;  %v2918_v2 = vpop.permute.xlu1 %842 }
 0x2e1   :  { %899 = vmatprep.subr.bf16.mxu0 %v814_v26 }
 0x2e4   :  { %900 = vmatpush1.bf16.msra.mxu0 %v813_v44  ;;  %v2925_v53 = vpop.permute.xlu1 %834 }
 0x2e7   :  { %1909 = vmatmul.mubr.msk.bf16.vlgmr.msra.gmra.mxu0 %vm550_vm0, %v2885_v17 }
 0x2e8   :  { %927 = vmatprep.mubr.bf16.mxu0 %v3279_v63 }
 0x2ef   :  { %1910 = vmatmul.mubr.msk.bf16.gmra.mxu0 %vm550_vm0, %v2893_v43 }
 0x2f0   :  { %937 = vmatprep.mubr.bf16.mxu0 %v3279_v63 }
 0x2f7   :  { %1911 = vmatmul.mubr.msk.bf16.gmra.mxu0 %vm550_vm0, %v2901_v23 }
 0x2f8   :  { %947 = vmatprep.mubr.bf16.mxu0 %v3279_v63 }
 0x2ff   :  { %1912 = vmatmul.mubr.msk.bf16.gmra.mxu0 %vm550_vm0, %v2909_v48  ;;  %v2930_v48 = vpop.permute.xlu0 %830 }
 0x300   :  { %1183 = vmatprep.mubr.bf16.mxu0 %v3279_v63 }
 0x3a7   :  { %v919_v7 = vpop.f32.mrf.mxu0 }
 0x3a9   :  { %v921_v49 = vpop.f32.mrf.mxu0 }
 0x3ab   :  { %v923_v47 = vpop.f32.mrf.mxu0 }
 0x3ad   :  { %v925_v27 = vpop.f32.mrf.mxu0 }
 0x3af   :  { %v929_v37 = vpop.f32.mrf.mxu0 }
 0x3b1   :  { %v931_v6 = vpop.f32.mrf.mxu0 }
 0x3b3   :  { %v933_v31 = vpop.f32.mrf.mxu0 }
 0x3b5   :  { %v935_v42 = vpop.f32.mrf.mxu0 }
 0x3b7   :  { %v939_v57 = vpop.f32.mrf.mxu0 }
 0x3b9   :  { %v941_v52 = vpop.f32.mrf.mxu0 }
 0x3ba   :  { %v942_v59 = vadd.f32 %v941_v52, %v2916_v25  ;;  %v2936_v52 = vpop.permute.xlu1 %826 }
 0x3bb   :  { %v943_v60 = vpop.f32.mrf.mxu0 }
 0x3bc   :  { %v944_v23 = vadd.f32 %v943_v60, %v2918_v2  ;;  %v926_v60 = vadd.f32 %v925_v27, %v2936_v52 }
 0x3bd   :  { %v945_v4 = vpop.f32.mrf.mxu0 }
 0x3be   :  { %v946_v18 = vadd.f32 %v945_v4, %v2918_v2  ;;  %v936_v4 = vadd.f32 %v935_v42, %v2925_v53 }
 0x3bf   :  { %v949_v32 = vpop.f32.mrf.mxu0 }
 0x3c0   :  { %v950_v39 = vadd.f32 %v949_v32, %v2914_v36  ;;  %v969_v17 = vmax.f32 %v946_v18, 0.0  ;;  %v932_v32 = vadd.f32 %v931_v6, %v2930_v48  ;;  %v2940_v18 = vpop.permute.xlu0 %822 }
 0x3c1   :  { %v951_v20 = vpop.f32.mrf.mxu0  ;;  %v922_v6 = vadd.f32 %v921_v49, %v2940_v18  ;;  %v920_v27 = vadd.f32 %v919_v7, %v2940_v18  ;;  %v2960_v7 = vld [vmem:[%s3170_s3 + $0x68] sm:$0xff]  }
 0x3c2   :  { %v952_v35 = vadd.f32 %v951_v20, %v2914_v36  ;;  %v970_v50 = vmax.f32 %v950_v39, 0.0  ;;  %v967_v36 = vmax.f32 %v942_v59, 0.0  ;;  %v924_v39 = vadd.f32 %v923_v47, %v2936_v52  ;;  %v2949_v47 = vld [vmem:[%s3170_s3 + $0x60] sm:$0xff]  }
 0x3c3   :  { %v953_v58 = vpop.f32.mrf.mxu0 }
 0x3c4   :  { %v954_v28 = vadd.f32 %v953_v58, %v2920_v56  ;;  %v971_v20 = vmax.f32 %v952_v35, 0.0  ;;  %v940_v58 = vadd.f32 %v939_v57, %v2916_v25  ;;  %v979_v42 = vpack.c.bf16 %v969_v17, %v967_v36 }
 0x3c5   :  { %v955_v26 = vpop.f32.mrf.mxu0  ;;  %v930_v57 = vadd.f32 %v929_v37, %v2930_v48  ;;  %v960_v36 = vmax.f32 %v924_v39, 0.0 }
 0x3c6   :  { %v956_v44 = vadd.f32 %v955_v26, %v2920_v56  ;;  %v972_v43 = vmax.f32 %v954_v28, 0.0  ;;  %v934_v26 = vadd.f32 %v933_v31, %v2925_v53  ;;  %v968_v56 = vmax.f32 %v944_v23, 0.0 }
 0x3c7   :  { %v965_v28 = vmax.f32 %v936_v4, 0.0  ;;  %v966_v35 = vmax.f32 %v940_v58, 0.0  ;;  %v962_v17 = vmax.f32 %v930_v57, 0.0  ;;  %v3005_v4 = vpop.permute.xlu1 %1011 }
 0x3c8   :  { %v973_v45 = vmax.f32 %v956_v44, 0.0  ;;  %v980_v15 = vpack.c.bf16 %v972_v43, %v970_v50  ;;  %v964_v31 = vmax.f32 %v934_v26, 0.0  ;;  %v961_v50 = vmax.f32 %v926_v60, 0.0  ;;  %v3003_v44 = vpop.permute.xlu0 %1007  ;;  %3304 = vst [vmem:[#allocation2_spill] sm:$0xff] %v3005_v4 }
 0x3c9   :  { %v978_v23 = vpack.c.bf16 %v968_v56, %v966_v35 }
 0x3ca   :  { %v981_v34 = vpack.c.bf16 %v973_v45, %v971_v20  ;;  %v963_v45 = vmax.f32 %v932_v32, 0.0  ;;  %v976_v37 = vpack.c.bf16 %v964_v31, %v962_v17 }
 0x3cb   :  { %v3009_v60 = vpop.permute.xlu1 %999 }
 0x3cc   :  { %1054 = vmatprep.subr.bf16.mxu1 %v981_v34  ;;  %v977_v43 = vpack.c.bf16 %v965_v28, %v963_v45  ;;  %v959_v34 = vmax.f32 %v922_v6, 0.0  ;;  %v3007_v32 = vpop.permute.xlu0 %1003 }
 0x3cd   :  { %1055 = vmatpush1.bf16.msra.mxu1 %v980_v15  ;;  %v958_v15 = vmax.f32 %v920_v27, 0.0 }
 0x3ce   :  { %1056 = vmatprep.subr.bf16.mxu1 %v979_v42  ;;  %v975_v59 = vpack.c.bf16 %v961_v50, %v959_v34 }
 0x3cf   :  { %v974_v49 = vpack.c.bf16 %v960_v36, %v958_v15 }
 0x3d0   :  { %v3014_v45 = vpop.permute.xlu0 %995 }
 0x3d1   :  { %1057 = vmatpush1.bf16.msra.mxu1 %v978_v23 }
 0x3d2   :  { %1058 = vmatprep.subr.bf16.mxu1 %v977_v43  ;;  %v3019_v43 = vpop.permute.xlu1 %991 }
 0x3d5   :  { %1059 = vmatpush1.bf16.msra.mxu1 %v976_v37 }
 0x3d6   :  { %1060 = vmatprep.subr.bf16.mxu1 %v975_v59 }
 0x3d9   :  { %1061 = vmatpush1.bf16.msra.mxu1 %v974_v49 }
 0x3da   :  { %1433 = vmatprep.subr.bf16.mxu1 %v2601_v1  ;;  %v2981_v1 = vld [vmem:[%s3170_s3 + $0x78] sm:$0xff]  }
 0x3dc   :  { %1917 = vmatmul.mubr.msk.bf16.vlgmr.msra.gmra.mxu1 %vm550_vm0, %v2949_v47 }
 0x3dd   :  { %1434 = vmatpush1.bf16.msra.mxu1 %v2595_v13  ;;  %1088 = vmatprep.mubr.bf16.mxu1 %v3279_v63  ;;  %v2972_v13 = vld [vmem:[%s3170_s3 + $0x70] sm:$0xff]  }
 0x3de   :  { %1435 = vmatprep.subr.bf16.mxu1 %v2694_v51  ;;  %v51_v51 = vld [vmem:[%s3171_s6] sm:$0xf] }
 0x3df   :  { %1145 = vperm.xlu1 %1971, %v51_v51  }
 0x3e1   :  { %1436 = vmatpush1.bf16.msra.mxu1 %v2696_v5 }
 0x3e2   :  { %1437 = vmatprep.subr.bf16.mxu1 %v2746_v46 }
 0x3e4   :  { %1918 = vmatmul.mubr.msk.bf16.gmra.mxu1 %vm550_vm0, %v2960_v7 }
 0x3e5   :  { %1438 = vmatpush1.bf16.msra.mxu1 %v2748_v16  ;;  %1098 = vmatprep.mubr.bf16.mxu1 %v3279_v63 }
 0x3e6   :  { %1439 = vmatprep.subr.bf16.mxu1 %v2750_v40 }
 0x3e9   :  { %1440 = vmatpush1.bf16.msra.mxu1 %v2752_v24 }
 0x3ec   :  { %1919 = vmatmul.mubr.msk.bf16.gmra.mxu1 %vm550_vm0, %v2972_v13 }
 0x3ed   :  { %1108 = vmatprep.mubr.bf16.mxu1 %v3279_v63 }
 0x3f4   :  { %1920 = vmatmul.mubr.msk.bf16.gmra.mxu1 %vm550_vm0, %v2981_v1 }
 0x3f5   :  { %1457 = vmatprep.mubr.bf16.mxu1 %v3279_v63 }
 0x3fc   :  { %1922 = vmatmul.mubr.msk.bf16.vlgmr.msra.gmra.mxu1 %vm550_vm0, %v2757_v12 }
 0x3fd   :  { %1467 = vmatprep.mubr.bf16.mxu1 %v3279_v63 }
 0x404   :  { %1923 = vmatmul.mubr.msk.bf16.gmra.mxu1 %vm550_vm0, %v2765_v54 }
 0x405   :  { %1477 = vmatprep.mubr.bf16.mxu1 %v3279_v63 }
 0x40c   :  { %1924 = vmatmul.mubr.msk.bf16.gmra.mxu1 %vm550_vm0, %v2773_v19 }
 0x40d   :  { %1487 = vmatprep.mubr.bf16.mxu1 %v3279_v63 }
 0x414   :  { %1925 = vmatmul.mubr.msk.bf16.gmra.mxu1 %vm550_vm0, %v2781_v30 }
 0x415   :  { %1651 = vmatprep.mubr.bf16.mxu1 %v3279_v63 }
 0x49c   :  { %v3001_v5 = vpop.f32.mrf.mxu1 }
 0x49e   :  { %v1082_v46 = vpop.f32.mrf.mxu1 }
 0x4a0   :  { %v1084_v16 = vpop.f32.mrf.mxu1 }
 0x4a2   :  { %v1086_v40 = vpop.f32.mrf.mxu1 }
 0x4a4   :  { %v1090_v24 = vpop.f32.mrf.mxu1 }
 0x4a6   :  { %v1092_v12 = vpop.f32.mrf.mxu1 }
 0x4a8   :  { %v1094_v54 = vpop.f32.mrf.mxu1 }
 0x4aa   :  { %v1096_v19 = vpop.f32.mrf.mxu1 }
 0x4ab   :  { %v1097_v36 = vadd.f32 %v1096_v19, %v3014_v45 }
 0x4ac   :  { %v1100_v56 = vpop.f32.mrf.mxu1 }
 0x4ad   :  { %v1101_v49 = vadd.f32 %v1100_v56, %v3009_v60  ;;  %v3035_v56 = vpop.permute.xlu1 %983 }
 0x4ae   :  { %v1102_v30 = vpop.f32.mrf.mxu1 }
 0x4af   :  { %v1103_v23 = vadd.f32 %v1102_v30, %v3009_v60  ;;  %v1093_v30 = vadd.f32 %v1092_v12, %v3019_v43  ;;  %v1127_v12 = vmax.f32 %v1101_v49, 0.0 }
 0x4b0   :  { %v1104_v20 = vpop.f32.mrf.mxu1 }
 0x4b1   :  { %v1105_v27 = vadd.f32 %v1104_v20, %v3007_v32  ;;  %v1095_v20 = vadd.f32 %v1094_v54, %v3014_v45 }
 0x4b2   :  { %v1106_v58 = vpop.f32.mrf.mxu1 }
 0x4b3   :  { %v1107_v57 = vadd.f32 %v1106_v58, %v3007_v32 }
 0x4b4   :  { %v1110_v26 = vpop.f32.mrf.mxu1 }
 0x4b5   :  { %v1111_v39 = vadd.f32 %v1110_v26, %v3003_v44  ;;  %v1130_v37 = vmax.f32 %v1107_v57, 0.0  ;;  %v1128_v26 = vmax.f32 %v1103_v23, 0.0  ;;  %v1126_v57 = vmax.f32 %v1097_v36, 0.0 }
 0x4b6   :  { %v1112_v28 = vpop.f32.mrf.mxu1 }
 0x4b7   :  { %v1113_v35 = vadd.f32 %v1112_v28, %v3003_v44  ;;  %v1131_v51 = vmax.f32 %v1111_v39, 0.0  ;;  %v1091_v39 = vadd.f32 %v1090_v24, %v3019_v43 }
 0x4b8   :  { %v1114_v42 = vpop.f32.mrf.mxu1 }
 0x4b9   :  { %v1115_v6 = vadd.f32 %v1114_v42, %v3005_v4  ;;  %v1132_v59 = vmax.f32 %v1113_v35, 0.0  ;;  %v3029_v42 = vpop.permute.xlu0 %987  ;;  %v1140_v35 = vpack.c.bf16 %v1130_v37, %v1128_v26  ;;  %v1081_v37 = vadd.f32 %v3001_v5, %v3035_v56  ;;  %v3045_v5 = vld [vmem:[%s3172_s5] sm:$0x3] }
 0x4ba   :  { %v1116_v31 = vpop.f32.mrf.mxu1  ;;  %v1087_v19 = vadd.f32 %v1086_v40, %v3029_v42  ;;  %v1085_v54 = vadd.f32 %v1084_v16, %v3029_v42  ;;  %3305 = vst [vmem:[#allocation3_spill] sm:$0xff] %v3045_v5 }
 0x4bb   :  { %v1117_v50 = vadd.f32 %v1116_v31, %v3005_v4  ;;  %v1133_v17 = vmax.f32 %v1115_v6, 0.0  ;;  %v1129_v6 = vmax.f32 %v1105_v27, 0.0  ;;  %v1125_v27 = vmax.f32 %v1095_v20, 0.0 }
 0x4bc   :  { %v3022_v34 = vpop.f32.mrf.mxu1  ;;  %v1122_v40 = vmax.f32 %v1087_v19, 0.0  ;;  %v1121_v26 = vmax.f32 %v1085_v54, 0.0 }
 0x4bd   :  { %v1134_v15 = vmax.f32 %v1117_v50, 0.0  ;;  %v1141_v31 = vpack.c.bf16 %v1133_v17, %v1131_v51  ;;  %v1083_v50 = vadd.f32 %v1082_v46, %v3035_v56  ;;  %v1139_v17 = vpack.c.bf16 %v1129_v6, %v1127_v12 }
 0x4be   :  { %v3026_v58 = vpop.f32.mrf.mxu1  ;;  %v1123_v51 = vmax.f32 %v1091_v39, 0.0 }
 0x4bf   :  { %v1142_v28 = vpack.c.bf16 %v1134_v15, %v1132_v59  ;;  %v1124_v59 = vmax.f32 %v1093_v30, 0.0  ;;  %v1120_v49 = vmax.f32 %v1083_v50, 0.0 }
 0x4c0   :  { %v3032_v4 = vpop.f32.mrf.mxu1 }
 0x4c1   :  { %1159 = vmatprep.subr.bf16.mxu0 %v1142_v28  ;;  %v1138_v36 = vpack.c.bf16 %v1126_v57, %v1124_v59  ;;  %v1137_v28 = vpack.c.bf16 %v1125_v27, %v1123_v51  ;;  %v1136_v30 = vpack.c.bf16 %v1122_v40, %v1120_v49 }
 0x4c2   :  { %1160 = vmatpush1.bf16.msra.mxu0 %v1141_v31  ;;  %v1465_v23 = vpop.f32.mrf.mxu1  ;;  %v1119_v31 = vmax.f32 %v1081_v37, 0.0 }
 0x4c3   :  { %1161 = vmatprep.subr.bf16.mxu0 %v1140_v35 }
 0x4c4   :  { %v1469_v15 = vpop.f32.mrf.mxu1  ;;  %v1135_v20 = vpack.c.bf16 %v1121_v26, %v1119_v31 }
 0x4c6   :  { %1162 = vmatpush1.bf16.msra.mxu0 %v1139_v17  ;;  %v1471_v24 = vpop.f32.mrf.mxu1 }
 0x4c7   :  { %1163 = vmatprep.subr.bf16.mxu0 %v1138_v36 }
 0x4c8   :  { %v1473_v46 = vpop.f32.mrf.mxu1 }
 0x4ca   :  { %1164 = vmatpush1.bf16.msra.mxu0 %v1137_v28  ;;  %v1475_v16 = vpop.f32.mrf.mxu1 }
 0x4cb   :  { %1165 = vmatprep.subr.bf16.mxu0 %v1136_v30  ;;  %v1476_v26 = vadd.f32 %v1475_v16, %v2797_v11  ;;  %v1470_v16 = vadd.f32 %v1469_v15, %v2802_v38 }
 0x4cc   :  { %v1479_v6 = vpop.f32.mrf.mxu1 }
 0x4ce   :  { %1166 = vmatpush1.bf16.msra.mxu0 %v1135_v20  ;;  %v1481_v19 = vpop.f32.mrf.mxu1  ;;  %v1480_v20 = vadd.f32 %v1479_v6, %v2792_v0 }
 0x4cf   :  { %v1482_v36 = vadd.f32 %v1481_v19, %v2792_v0  ;;  %v1462_v0 = vadd.f32 %v3026_v58, %v2812_v29 }
 0x4d0   :  { %v1483_v57 = vpop.f32.mrf.mxu1 }
 0x4d1   :  { %1921 = vmatmul.mubr.msk.bf16.vlgmr.msra.gmra.mxu0 %vm550_vm0, %v3045_v5  ;;  %v1484_v51 = vadd.f32 %v1483_v57, %v2790_v61 }
 0x4d2   :  { %v1485_v35 = vpop.f32.mrf.mxu1  ;;  %1554 = vmatprep.mubr.bf16.mxu0 %v3279_v63 }
 0x4d3   :  { %v1486_v59 = vadd.f32 %v1485_v35, %v2790_v61  ;;  %v1508_v19 = vmax.f32 %v1484_v51, 0.0  ;;  %v1505_v61 = vmax.f32 %v1476_v26, 0.0 }
 0x4d4   :  { %v1489_v39 = vpop.f32.mrf.mxu1 }
 0x4d5   :  { %v1490_v17 = vadd.f32 %v1489_v39, %v2788_v22  ;;  %v1509_v28 = vmax.f32 %v1486_v59, 0.0  ;;  %v1474_v39 = vadd.f32 %v1473_v46, %v2797_v11  ;;  %v1506_v59 = vmax.f32 %v1480_v20, 0.0 }
 0x4d6   :  { %v1491_v12 = vpop.f32.mrf.mxu1 }
 0x4d7   :  { %v1492_v54 = vadd.f32 %v1491_v12, %v2788_v22  ;;  %v1510_v35 = vmax.f32 %v1490_v17, 0.0  ;;  %v1472_v12 = vadd.f32 %v1471_v24, %v2802_v38  ;;  %v1464_v24 = vadd.f32 %v3032_v4, %v2808_v21 }
 0x4d8   :  { %v1493_v50 = vpop.f32.mrf.mxu1  ;;  %v1504_v11 = vmax.f32 %v1474_v39, 0.0  ;;  %v1518_v46 = vpack.c.bf16 %v1508_v19, %v1506_v59  ;;  %v1502_v17 = vmax.f32 %v1470_v16, 0.0  ;;  %v1499_v38 = vmax.f32 %v1462_v0, 0.0 }
 0x4d9   :  { %v1494_v27 = vadd.f32 %v1493_v50, %v2786_v41  ;;  %v1511_v30 = vmax.f32 %v1492_v54, 0.0  ;;  %v1507_v50 = vmax.f32 %v1482_v36, 0.0  ;;  %v1503_v6 = vmax.f32 %v1472_v12, 0.0 }
 0x4da   :  { %v1495_v40 = vpop.f32.mrf.mxu1  ;;  %v1500_v15 = vmax.f32 %v1464_v24, 0.0 }
 0x4db   :  { %v1496_v37 = vadd.f32 %v1495_v40, %v2786_v41  ;;  %v1512_v49 = vmax.f32 %v1494_v27, 0.0  ;;  %v1466_v41 = vadd.f32 %v1465_v23, %v2808_v21  ;;  %v1519_v57 = vpack.c.bf16 %v1509_v28, %v1507_v50  ;;  %v3081_v21 = vpop.permute.xlu1 %1145 }
 0x4dc   :  { %v1517_v27 = vpack.c.bf16 %v1505_v61, %v1503_v6  ;;  %v1460_v23 = vadd.f32 %v3022_v34, %v2812_v29 }
 0x4dd   :  { %v1513_v31 = vmax.f32 %v1496_v37, 0.0  ;;  %v1520_v5 = vpack.c.bf16 %v1512_v49, %v1510_v35  ;;  %v1501_v54 = vmax.f32 %v1466_v41, 0.0 }
 0x4de   :  { %v1498_v58 = vmax.f32 %v1460_v23, 0.0  ;;  %v3306_v23 = vld [vmem:[#allocation16_spill] sm:$0xff] }
 0x4df   :  { %v1521_v22 = vpack.c.bf16 %v1513_v31, %v1511_v30  ;;  %v1515_v40 = vpack.c.bf16 %v1501_v54, %v1499_v38 }
 0x4e0   :  { %v1514_v36 = vpack.c.bf16 %v1500_v15, %v1498_v58 }
 0x4e1   :  { %1530 = vmatprep.subr.bf16.mxu0 %v1521_v22 }
 0x4e2   :  { %1531 = vmatpush1.bf16.msra.mxu0 %v1520_v5  ;;  %v1516_v5 = vpack.c.bf16 %v1504_v11, %v1502_v17 }
 0x4e3   :  { %1532 = vmatprep.subr.bf16.mxu0 %v1519_v57 }
 0x4e6   :  { %1533 = vmatpush1.bf16.msra.mxu0 %v1518_v46 }
 0x4e7   :  { %1534 = vmatprep.subr.bf16.mxu0 %v1517_v27 }
 0x4ea   :  { %1535 = vmatpush1.bf16.msra.mxu0 %v1516_v5 }
 0x4eb   :  { %1536 = vmatprep.subr.bf16.mxu0 %v1515_v40 }
 0x4ee   :  { %1537 = vmatpush1.bf16.msra.mxu0 %v1514_v36  ;;  %v3307_v36 = vld [vmem:[#allocation13_spill] sm:$0xff] }
 0x4f1   :  { %1926 = vmatmul.mubr.msk.bf16.vlgmr.msra.gmra.mxu0 %vm550_vm0, %v2821_v8 }
 0x4f2   :  { %1564 = vmatprep.mubr.bf16.mxu0 %v3279_v63 }
 0x4f9   :  { %1927 = vmatmul.mubr.msk.bf16.gmra.mxu0 %vm550_vm0, %v2829_v55 }
 0x4fa   :  { %1574 = vmatprep.mubr.bf16.mxu0 %v3279_v63 }
 0x501   :  { %1928 = vmatmul.mubr.msk.bf16.gmra.mxu0 %vm550_vm0, %v2837_v9 }
 0x502   :  { %1584 = vmatprep.mubr.bf16.mxu0 %v3279_v63 }
 0x509   :  { %1929 = vmatmul.mubr.msk.bf16.gmra.mxu0 %vm550_vm0, %v2845_v62 }
 0x50a   :  { %1748 = vmatprep.mubr.bf16.mxu0 %v3279_v63 }
 0x591   :  { %v1185_v29 = vpop.f32.mrf.mxu0 }
 0x592   :  { %v1186_v8 = vadd.f32 %v1185_v29, %v3081_v21 }
 0x593   :  { %v1187_v4 = vpop.f32.mrf.mxu0 }
 0x594   :  { %v1188_v55 = vadd.f32 %v1187_v4, %v3081_v21  ;;  %1989 = vtanh.f32 %v1186_v8 }
 0x595   :  { %v1189_v34 = vpop.f32.mrf.mxu0 }
 0x596   :  { %1991 = vtanh.f32 %v1188_v55 }
 0x597   :  { %v1190_v37 = vpop.f32.mrf.mxu0 }
 0x5a1   :  { %v1990_v9 = vpop.eup %1989 }
 0x5a3   :  { %v1992_v51 = vpop.eup %1991 }
 0x5a4   :  { %v1196_v49 = vcombine.low %v1990_v9, %v1992_v51 }
 0x5a6   :  { %1198 = vst [vmem:[%s3173_s7] sm:$0xff] %v1196_v49 }
 0x5b1   :  { %v1556_v62 = vpop.f32.mrf.mxu0 }
 0x5b3   :  { %v1558_v26 = vpop.f32.mrf.mxu0 }
 0x5b5   :  { %v1560_v28 = vpop.f32.mrf.mxu0 }
 0x5b7   :  { %v1562_v30 = vpop.f32.mrf.mxu0 }
 0x5b9   :  { %v1566_v31 = vpop.f32.mrf.mxu0 }
 0x5ba   :  { %v1567_v51 = vadd.f32 %v1566_v31, %v3307_v36 }
 0x5bb   :  { %v1568_v20 = vpop.f32.mrf.mxu0 }
 0x5bc   :  { %v1569_v29 = vadd.f32 %v1568_v20, %v3307_v36 }
 0x5bd   :  { %v1570_v35 = vpop.f32.mrf.mxu0 }
 0x5be   :  { %v1571_v4 = vadd.f32 %v1570_v35, %v3306_v23 }
 0x5bf   :  { %v1572_v12 = vpop.f32.mrf.mxu0 }
 0x5c0   :  { %v1573_v17 = vadd.f32 %v1572_v12, %v3306_v23  ;;  %v3309_v12 = vld [vmem:[#allocation8_spill] sm:$0xff] }
 0x5c1   :  { %v1576_v50 = vpop.f32.mrf.mxu0 }
 0x5c2   :  { %v1577_v40 = vadd.f32 %v1576_v50, %v2856_v3  ;;  %v1600_v50 = vmax.f32 %v1569_v29, 0.0 }
 0x5c3   :  { %v1578_v22 = vpop.f32.mrf.mxu0 }
 0x5c4   :  { %v1579_v11 = vadd.f32 %v1578_v22, %v2856_v3  ;;  %v1603_v49 = vmax.f32 %v1577_v40, 0.0  ;;  %v1559_v3 = vadd.f32 %v1558_v26, %v3309_v12  ;;  %v1601_v22 = vmax.f32 %v1571_v4, 0.0  ;;  %v3314_v4 = vld [vmem:[#allocation15_spill] sm:$0xff] }
 0x5c5   :  { %v1580_v39 = vpop.f32.mrf.mxu0 }
 0x5c6   :  { %v1581_v54 = vadd.f32 %v1580_v39, %v2854_v14  ;;  %v1604_v8 = vmax.f32 %v1579_v11, 0.0 }
 0x5c7   :  { %v1582_v19 = vpop.f32.mrf.mxu0 }
 0x5c8   :  { %v1583_v16 = vadd.f32 %v1582_v19, %v2854_v14  ;;  %v1605_v55 = vmax.f32 %v1581_v54, 0.0  ;;  %v1602_v14 = vmax.f32 %v1573_v17, 0.0 }
 0x5c9   :  { %v1586_v41 = vpop.f32.mrf.mxu0 }
 0x5ca   :  { %v1587_v6 = vadd.f32 %v1586_v41, %v2850_v10  ;;  %v1606_v38 = vmax.f32 %v1583_v16, 0.0  ;;  %v1615_v39 = vpack.c.bf16 %v1605_v55, %v1603_v49  ;;  %v1614_v19 = vpack.c.bf16 %v1602_v14, %v1600_v50 }
 0x5cb   :  { %v1588_v61 = vpop.f32.mrf.mxu0  ;;  %v1557_v41 = vadd.f32 %v1556_v62, %v3309_v12  ;;  %v3312_v62 = vld [vmem:[#allocation4_spill] sm:$0xff] }
 0x5cc   :  { %v1589_v59 = vadd.f32 %v1588_v61, %v2850_v10  ;;  %v1607_v58 = vmax.f32 %v1587_v6, 0.0  ;;  %v1616_v9 = vpack.c.bf16 %v1606_v38, %v1604_v8  ;;  %v1596_v61 = vmax.f32 %v1559_v3, 0.0  ;;  %v3313_v6 = vld [vmem:[#allocation14_spill] sm:$0xff] }
 0x5cd   :  { %v1590_v57 = vpop.f32.mrf.mxu0 }
 0x5ce   :  { %v1591_v0 = vadd.f32 %v1590_v57, %v2852_v33  ;;  %v1608_v15 = vmax.f32 %v1589_v59, 0.0  ;;  %v1595_v59 = vmax.f32 %v1557_v41, 0.0 }
 0x5cf   :  { %v1592_v24 = vpop.f32.mrf.mxu0 }
 0x5d0   :  { %v1593_v46 = vadd.f32 %v1592_v24, %v2852_v33  ;;  %v1609_v27 = vmax.f32 %v1591_v0, 0.0  ;;  %v3308_v33 = vld [vmem:[#allocation23_spill] sm:$0xff]  ;;  %v3310_v0 = vld [vmem:[#allocation24_spill] sm:$0xff] }
 0x5d1   :  { %v1563_v37 = vadd.f32 %v1562_v30, %v3308_v33  ;;  %v1561_v20 = vadd.f32 %v1560_v28, %v3308_v33  ;;  %v1599_v30 = vmax.f32 %v1567_v51, 0.0  ;;  %v3311_v28 = vld [vmem:[#allocation9_spill] sm:$0xff] }
 0x5d2   :  { %v1610_v5 = vmax.f32 %v1593_v46, 0.0  ;;  %v1617_v34 = vpack.c.bf16 %v1609_v27, %v1607_v58 }
 0x5d3   :  { %v1598_v35 = vmax.f32 %v1563_v37, 0.0  ;;  %v1597_v57 = vmax.f32 %v1561_v20, 0.0  ;;  %v1613_v31 = vpack.c.bf16 %v1601_v22, %v1599_v30 }
 0x5d4   :  { %v1618_v10 = vpack.c.bf16 %v1610_v5, %v1608_v15 }
 0x5d5   :  { %v1612_v16 = vpack.c.bf16 %v1598_v35, %v1596_v61  ;;  %v1611_v26 = vpack.c.bf16 %v1597_v57, %v1595_v59 }
 0x5d6   :  { %1627 = vmatprep.subr.bf16.mxu1 %v1618_v10 }
 0x5d7   :  { %1628 = vmatpush1.bf16.msra.mxu1 %v1617_v34  ;;  %v3315_v34 = vld [vmem:[#allocation5_spill] sm:$0xff] }
 0x5d8   :  { %1629 = vmatprep.subr.bf16.mxu1 %v1616_v9 }
 0x5db   :  { %1630 = vmatpush1.bf16.msra.mxu1 %v1615_v39 }
 0x5dc   :  { %1631 = vmatprep.subr.bf16.mxu1 %v1614_v19 }
 0x5df   :  { %1632 = vmatpush1.bf16.msra.mxu1 %v1613_v31 }
 0x5e0   :  { %1633 = vmatprep.subr.bf16.mxu1 %v1612_v16 }
 0x5e3   :  { %1634 = vmatpush1.bf16.msra.mxu1 %v1611_v26 }
 0x5e6   :  { %1930 = vmatmul.mubr.msk.bf16.vlgmr.msra.gmra.mxu1 %vm550_vm0, %v3310_v0 }
 0x5e7   :  { %1661 = vmatprep.mubr.bf16.mxu1 %v3279_v63 }
 0x5ee   :  { %1931 = vmatmul.mubr.msk.bf16.gmra.mxu1 %vm550_vm0, %v3311_v28 }
 0x5ef   :  { %1671 = vmatprep.mubr.bf16.mxu1 %v3279_v63 }
 0x5f6   :  { %1932 = vmatmul.mubr.msk.bf16.gmra.mxu1 %vm550_vm0, %v3312_v62 }
 0x5f7   :  { %1681 = vmatprep.mubr.bf16.mxu1 %v3279_v63 }
 0x5fe   :  { %1933 = vmatmul.mubr.msk.bf16.gmra.mxu1 %vm550_vm0, %v3313_v6 }
 0x5ff   :  { %1845 = vmatprep.mubr.bf16.mxu1 %v3279_v63 }
 0x6a6   :  { %v1653_v24 = vpop.f32.mrf.mxu1 }
 0x6a8   :  { %v1655_v11 = vpop.f32.mrf.mxu1 }
 0x6aa   :  { %v1657_v46 = vpop.f32.mrf.mxu1 }
 0x6ab   :  { %v1658_v62 = vadd.f32 %v1657_v46, %v2936_v52 }
 0x6ac   :  { %v1659_v54 = vpop.f32.mrf.mxu1 }
 0x6ad   :  { %v1660_v16 = vadd.f32 %v1659_v54, %v2936_v52 }
 0x6ae   :  { %v1663_v27 = vpop.f32.mrf.mxu1 }
 0x6af   :  { %v1664_v26 = vadd.f32 %v1663_v27, %v2930_v48 }
 0x6b0   :  { %v1665_v23 = vpop.f32.mrf.mxu1 }
 0x6b1   :  { %v1666_v19 = vadd.f32 %v1665_v23, %v2930_v48  ;;  %v1696_v54 = vmax.f32 %v1664_v26, 0.0 }
 0x6b2   :  { %v1667_v17 = vpop.f32.mrf.mxu1 }
 0x6b3   :  { %v1668_v61 = vadd.f32 %v1667_v17, %v2925_v53  ;;  %v1697_v28 = vmax.f32 %v1666_v19, 0.0 }
 0x6b4   :  { %v1669_v38 = vpop.f32.mrf.mxu1 }
 0x6b5   :  { %v1670_v3 = vadd.f32 %v1669_v38, %v2925_v53  ;;  %v1698_v6 = vmax.f32 %v1668_v61, 0.0  ;;  %v1695_v53 = vmax.f32 %v1660_v16, 0.0  ;;  %v1654_v38 = vadd.f32 %v1653_v24, %v2940_v18 }
 0x6b6   :  { %v1673_v15 = vpop.f32.mrf.mxu1 }
 0x6b7   :  { %v1674_v39 = vadd.f32 %v1673_v15, %v2916_v25  ;;  %v1710_v48 = vpack.c.bf16 %v1698_v6, %v1696_v54 }
 0x6b8   :  { %v1675_v5 = vpop.f32.mrf.mxu1 }
 0x6b9   :  { %v1676_v9 = vadd.f32 %v1675_v5, %v2916_v25  ;;  %v1700_v0 = vmax.f32 %v1674_v39, 0.0  ;;  %v1656_v25 = vadd.f32 %v1655_v11, %v2940_v18  ;;  %v1694_v5 = vmax.f32 %v1658_v62, 0.0 }
 0x6ba   :  { %v1677_v40 = vpop.f32.mrf.mxu1 }
 0x6bb   :  { %v1678_v49 = vadd.f32 %v1677_v40, %v2918_v2  ;;  %v1701_v41 = vmax.f32 %v1676_v9, 0.0  ;;  %v1693_v15 = vmax.f32 %v1656_v25, 0.0  ;;  %v1692_v40 = vmax.f32 %v1654_v38, 0.0 }
 0x6bc   :  { %v1679_v58 = vpop.f32.mrf.mxu1 }
 0x6bd   :  { %v1680_v10 = vadd.f32 %v1679_v58, %v2918_v2  ;;  %v1702_v57 = vmax.f32 %v1678_v49, 0.0  ;;  %v1699_v2 = vmax.f32 %v1670_v3, 0.0  ;;  %v1709_v27 = vpack.c.bf16 %v1695_v53, %v1693_v15 }
 0x6be   :  { %v1683_v36 = vpop.f32.mrf.mxu1  ;;  %v1708_v11 = vpack.c.bf16 %v1694_v5, %v1692_v40 }
 0x6bf   :  { %v1684_v37 = vadd.f32 %v1683_v36, %v3314_v4  ;;  %v1703_v50 = vmax.f32 %v1680_v10, 0.0  ;;  %v1712_v23 = vpack.c.bf16 %v1702_v57, %v1700_v0  ;;  %v1711_v17 = vpack.c.bf16 %v1699_v2, %v1697_v28 }
 0x6c0   :  { %v1685_v29 = vpop.f32.mrf.mxu1 }
 0x6c1   :  { %v1686_v55 = vadd.f32 %v1685_v29, %v3314_v4  ;;  %v1704_v35 = vmax.f32 %v1684_v37, 0.0  ;;  %v1713_v59 = vpack.c.bf16 %v1703_v50, %v1701_v41 }
 0x6c2   :  { %v1687_v8 = vpop.f32.mrf.mxu1 }
 0x6c3   :  { %v1688_v33 = vadd.f32 %v1687_v8, %v3315_v34  ;;  %v1705_v20 = vmax.f32 %v1686_v55, 0.0 }
 0x6c4   :  { %v1689_v14 = vpop.f32.mrf.mxu1 }
 0x6c5   :  { %v1690_v51 = vadd.f32 %v1689_v14, %v3315_v34  ;;  %v1706_v12 = vmax.f32 %v1688_v33, 0.0 }
 0x6c7   :  { %v1707_v22 = vmax.f32 %v1690_v51, 0.0  ;;  %v1714_v31 = vpack.c.bf16 %v1706_v12, %v1704_v35 }
 0x6c9   :  { %v1715_v30 = vpack.c.bf16 %v1707_v22, %v1705_v20 }
 0x6cb   :  { %1724 = vmatprep.subr.bf16.mxu0 %v1715_v30 }
 0x6cc   :  { %1725 = vmatpush1.bf16.msra.mxu0 %v1714_v31 }
 0x6cd   :  { %1726 = vmatprep.subr.bf16.mxu0 %v1713_v59 }
 0x6d0   :  { %1727 = vmatpush1.bf16.msra.mxu0 %v1712_v23 }
 0x6d1   :  { %1728 = vmatprep.subr.bf16.mxu0 %v1711_v17 }
 0x6d4   :  { %1729 = vmatpush1.bf16.msra.mxu0 %v1710_v48  ;;  %v3317_v48 = vld [vmem:[#allocation3_spill] sm:$0xff] }
 0x6d5   :  { %1730 = vmatprep.subr.bf16.mxu0 %v1709_v27 }
 0x6d8   :  { %1731 = vmatpush1.bf16.msra.mxu0 %v1708_v11 }
 0x6db   :  { %1934 = vmatmul.mubr.msk.bf16.vlgmr.msra.gmra.mxu0 %vm550_vm0, %v2949_v47 }
 0x6dc   :  { %1758 = vmatprep.mubr.bf16.mxu0 %v3279_v63 }
 0x6e3   :  { %1935 = vmatmul.mubr.msk.bf16.gmra.mxu0 %vm550_vm0, %v2960_v7 }
 0x6e4   :  { %1768 = vmatprep.mubr.bf16.mxu0 %v3279_v63 }
 0x6eb   :  { %1936 = vmatmul.mubr.msk.bf16.gmra.mxu0 %vm550_vm0, %v2972_v13 }
 0x6ec   :  { %1778 = vmatprep.mubr.bf16.mxu0 %v3279_v63 }
 0x6f3   :  { %1937 = vmatmul.mubr.msk.bf16.gmra.mxu0 %vm550_vm0, %v2981_v1  ;;  %v3316_v1 = vld [vmem:[#allocation2_spill] sm:$0xff] }
 0x79b   :  { %v1750_v52 = vpop.f32.mrf.mxu0 }
 0x79c   :  { %v1751_v23 = vadd.f32 %v1750_v52, %v3035_v56 }
 0x79d   :  { %v1752_v18 = vpop.f32.mrf.mxu0 }
 0x79e   :  { %v1789_v15 = vmax.f32 %v1751_v23, 0.0 }
 0x79f   :  { %v1754_v24 = vpop.f32.mrf.mxu0 }
 0x7a0   :  { %v1755_v25 = vadd.f32 %v1754_v24, %v3029_v42 }
 0x7a1   :  { %v1756_v46 = vpop.f32.mrf.mxu0 }
 0x7a2   :  { %v1757_v16 = vadd.f32 %v1756_v46, %v3029_v42  ;;  %v1791_v38 = vmax.f32 %v1755_v25, 0.0 }
 0x7a3   :  { %v1760_v47 = vpop.f32.mrf.mxu0 }
 0x7a4   :  { %v1761_v59 = vadd.f32 %v1760_v47, %v3019_v43  ;;  %v1805_v5 = vpack.c.bf16 %v1791_v38, %v1789_v15 }
 0x7a5   :  { %v1762_v58 = vpop.f32.mrf.mxu0 }
 0x7a6   :  { %v1763_v41 = vadd.f32 %v1762_v58, %v3019_v43  ;;  %v1793_v53 = vmax.f32 %v1761_v59, 0.0 }
 0x7a7   :  { %v1764_v36 = vpop.f32.mrf.mxu0 }
 0x7a8   :  { %v1765_v61 = vadd.f32 %v1764_v36, %v3014_v45  ;;  %v1794_v0 = vmax.f32 %v1763_v41, 0.0 }
 0x7a9   :  { %v1766_v29 = vpop.f32.mrf.mxu0 }
 0x7aa   :  { %v1767_v50 = vadd.f32 %v1766_v29, %v3014_v45  ;;  %v1795_v28 = vmax.f32 %v1765_v61, 0.0  ;;  %v1792_v45 = vmax.f32 %v1757_v16, 0.0 }
 0x7ab   :  { %v1770_v8 = vpop.f32.mrf.mxu0 }
 0x7ac   :  { %v1771_v35 = vadd.f32 %v1770_v8, %v3009_v60  ;;  %v1807_v43 = vpack.c.bf16 %v1795_v28, %v1793_v53 }
 0x7ad   :  { %v1772_v7 = vpop.f32.mrf.mxu0 }
 0x7ae   :  { %v1773_v51 = vadd.f32 %v1772_v7, %v3009_v60  ;;  %v1797_v26 = vmax.f32 %v1771_v35, 0.0  ;;  %v1753_v60 = vadd.f32 %v1752_v18, %v3035_v56 }
 0x7af   :  { %v1774_v10 = vpop.f32.mrf.mxu0 }
 0x7b0   :  { %v1775_v12 = vadd.f32 %v1774_v10, %v3007_v32  ;;  %v1798_v30 = vmax.f32 %v1773_v51, 0.0  ;;  %v1790_v17 = vmax.f32 %v1753_v60, 0.0 }
 0x7b1   :  { %v1776_v4 = vpop.f32.mrf.mxu0 }
 0x7b2   :  { %v1777_v63 = vadd.f32 %v1776_v4, %v3007_v32  ;;  %v1799_v57 = vmax.f32 %v1775_v12, 0.0  ;;  %v1796_v32 = vmax.f32 %v1767_v50, 0.0  ;;  %v1806_v54 = vpack.c.bf16 %v1792_v45, %v1790_v17 }
 0x7b3   :  { %v1780_v55 = vpop.f32.mrf.mxu0 }
 0x7b4   :  { %v1781_v14 = vadd.f32 %v1780_v55, %v3003_v44  ;;  %v1800_v20 = vmax.f32 %v1777_v63, 0.0  ;;  %v1809_v62 = vpack.c.bf16 %v1799_v57, %v1797_v26  ;;  %v1808_v6 = vpack.c.bf16 %v1796_v32, %v1794_v0 }
 0x7b5   :  { %v1782_v34 = vpop.f32.mrf.mxu0 }
 0x7b6   :  { %v1783_v33 = vadd.f32 %v1782_v34, %v3003_v44  ;;  %v1801_v19 = vmax.f32 %v1781_v14, 0.0  ;;  %v1810_v2 = vpack.c.bf16 %v1800_v20, %v1798_v30 }
 0x7b7   :  { %v1784_v13 = vpop.f32.mrf.mxu0 }
 0x7b8   :  { %v1785_v37 = vadd.f32 %v1784_v13, %v3316_v1  ;;  %v1802_v22 = vmax.f32 %v1783_v33, 0.0 }
 0x7b9   :  { %v1786_v9 = vpop.f32.mrf.mxu0 }
 0x7ba   :  { %v1787_v49 = vadd.f32 %v1786_v9, %v3316_v1  ;;  %v1803_v3 = vmax.f32 %v1785_v37, 0.0 }
 0x7bc   :  { %v1804_v39 = vmax.f32 %v1787_v49, 0.0  ;;  %v1811_v31 = vpack.c.bf16 %v1803_v3, %v1801_v19 }
 0x7be   :  { %v1812_v44 = vpack.c.bf16 %v1804_v39, %v1802_v22 }
 0x7c0   :  { %1821 = vmatprep.subr.bf16.mxu1 %v1812_v44 }
 0x7c1   :  { %1822 = vmatpush1.bf16.msra.mxu1 %v1811_v31 }
 0x7c2   :  { %1823 = vmatprep.subr.bf16.mxu1 %v1810_v2 }
 0x7c5   :  { %1824 = vmatpush1.bf16.msra.mxu1 %v1809_v62 }
 0x7c6   :  { %1825 = vmatprep.subr.bf16.mxu1 %v1808_v6 }
 0x7c9   :  { %1826 = vmatpush1.bf16.msra.mxu1 %v1807_v43 }
 0x7ca   :  { %1827 = vmatprep.subr.bf16.mxu1 %v1806_v54 }
 0x7cd   :  { %1828 = vmatpush1.bf16.msra.mxu1 %v1805_v5 }
 0x7d0   :  { %1938 = vmatmul.mubr.msk.bf16.vlgmr.msra.gmra.mxu1 %vm550_vm0, %v3317_v48 }
 0x890   :  { %v1847_v42 = vpop.f32.mrf.mxu1 }
 0x891   :  { %v1848_v27 = vadd.f32 %v1847_v42, %v3081_v21 }
 0x892   :  { %v1849_v40 = vpop.f32.mrf.mxu1 }
 0x893   :  { %v1850_v56 = vadd.f32 %v1849_v40, %v3081_v21  ;;  %1993 = vtanh.f32 %v1848_v27 }
 0x894   :  { %v1851_v11 = vpop.f32.mrf.mxu1 }
 0x895   :  { %1995 = vtanh.f32 %v1850_v56 }
 0x896   :  { %v1852_v52 = vpop.f32.mrf.mxu1 }
 0x8a0   :  { %v1994_v18 = vpop.eup %1993 }
 0x8a2   :  { %v1996_v24 = vpop.eup %1995 }
 0x8a3   :  { %v1858_v46 = vcombine.low %v1994_v18, %v1996_v24 }
 0x8a5   :  { %1860 = vst [vmem:[%s3173_s7 + $0x8] sm:$0xff] %v1858_v46 }

</bundles_post_ra>
